<compile_context>
chip_gen: v5e
topology: v5e:2x2
jax: 0.10.0
libtpu: 0.0.40
codegen_flags: <defaults>
</compile_context>

<pallas_src>
import functools
import math

import jax
import jax.numpy as jnp
from jax.experimental import pallas as pl
from jax.experimental.pallas import tpu as pltpu

D_MODEL = 128
N_HEADS = 4
HEAD_DIM = D_MODEL // N_HEADS


def _attention_kernel(x_ref, wqkv_ref, bqkv_ref, wo_ref, bo_ref, o_ref, *,
                      batch_block, seq_len, n_heads, head_dim):
    d_model = n_heads * head_dim
    rows = batch_block * seq_len

    x = x_ref[...]                                           # (rows, D) bf16

    # ---- fused Q/K/V projection: one wide MXU pass (N = 3D), f32 accum ----
    qkv = jnp.dot(x, wqkv_ref[...], preferred_element_type=jnp.float32)
    qkv = qkv + bqkv_ref[...]                                # f32 bias add
    # NOTE: 1/sqrt(head_dim) is already folded into the Q columns (wrapper).

    q = qkv[:, :d_model]
    k = qkv[:, d_model:2 * d_model]
    v = qkv[:, 2 * d_model:]

    def split_heads(t):        # (rows, D) -> (bb*H, S, hd) head-batched layout
        t = t.reshape(batch_block, seq_len, n_heads, head_dim)
        t = jnp.transpose(t, (0, 2, 1, 3))
        return t.reshape(batch_block * n_heads, seq_len, head_dim)

    qh = split_heads(q).astype(jnp.bfloat16)
    kh = split_heads(k).astype(jnp.bfloat16)
    vh = split_heads(v).astype(jnp.bfloat16)

    # ---- batched scores for every (batch, head) pair at once: (bb*H, S, S) --
    # TODO(synk): KV-tiled online-softmax (flash) loop before long sequences.
    s = jnp.einsum('bqd,bkd->bqk', qh, kh,
                   preferred_element_type=jnp.float32)
    m = jnp.max(s, axis=-1, keepdims=True)                   # f32 softmax
    e = jnp.exp(s - m)
    l = jnp.sum(e, axis=-1, keepdims=True)
    p = (e / l).astype(jnp.bfloat16)     # exact divide (approx recip broke 1e-4)

    ctx = jnp.einsum('bqk,bkd->bqd', p, vh,
                     preferred_element_type=jnp.float32)     # (bb*H, S, hd)
    ctx = ctx.reshape(batch_block, n_heads, seq_len, head_dim)
    ctx = jnp.transpose(ctx, (0, 2, 1, 3)).reshape(rows, d_model)

    # ---- output projection on all rows of the block (lane-dense, N = 128) ---
    out = jnp.dot(ctx.astype(jnp.bfloat16), wo_ref[...],
                  preferred_element_type=jnp.float32)
    out = out + bo_ref[...]
    o_ref[...] = out.astype(o_ref.dtype)


def _pick_batch_block(batch, seq_len, max_rows=2048):
    """Batches per grid step: large row blocks (big MXU M, amortize ~0.35us
    per-step overhead) while keeping >=2 grid steps for v7x's two cores."""
    bb = max(1, min(batch, max(1, max_rows // max(seq_len, 1))))
    if batch >= 2:
        bb = min(bb, max(1, batch // 2))      # grid >= 2 steps (v7x megacore)
    while batch % bb != 0:
        bb -= 1
    if (bb * seq_len) % 8 != 0 and bb != batch:
        # TODO(synk): pad S to a multiple of 8 (with key masking) instead of
        # falling back to a single full-array block.
        bb = batch
    return bb


def _vmem_limit_bytes(rows, d, bb, n_heads, seq_len):
    blocks = (rows * d * 2        # x block (bf16)
              + rows * d * 4      # out block (f32)
              + d * 3 * d * 2     # W_qkv (bf16)
              + 3 * d * 4         # b_qkv (f32)
              + d * d * 2         # W_out (bf16)
              + d * 4)            # b_out (f32)
    temps = (rows * 3 * d * 4           # qkv (f32)
             + 3 * rows * d * 2         # qh/kh/vh (bf16)
             + 3 * bb * n_heads * seq_len * seq_len * 4   # scores/exp/probs
             + 2 * rows * d * 4)        # ctx + out (f32)
    est = 2 * blocks + temps            # BlockSpec double-buffers the blocks
    return int(min(64 << 20, max(32 << 20, 2 * est)))


def attention_forward(x, params):
    """x: (B, S, D) float32. params: dict of wq, bq, wk, bk, wv, bv, wo, bo."""
    b, s, d = x.shape
    assert d == D_MODEL and d % N_HEADS == 0
    out_dtype = x.dtype

    scale = 1.0 / math.sqrt(HEAD_DIM)
    # Fold the attention scale into the Q projection and fuse Q/K/V weights
    # into one (D, 3D) operand (both done once, wrapper-side).
    wqkv = jnp.concatenate(
        [params["wq"] * scale, params["wk"], params["wv"]], axis=1)
    bqkv = jnp.concatenate(
        [params["bq"] * scale, params["bk"], params["bv"]], axis=1)

    # bf16 MXU operands, cast once here; biases stay f32.
    wqkv_bf = wqkv.astype(jnp.bfloat16)
    wo_bf = params["wo"].astype(jnp.bfloat16)
    bqkv_f32 = bqkv.astype(jnp.float32)
    bo_f32 = params["bo"].astype(jnp.float32)

    bb = _pick_batch_block(b, s)
    rows = bb * s
    x_flat = x.reshape(b * s, d).astype(jnp.bfloat16)

    kernel = functools.partial(_attention_kernel, batch_block=bb, seq_len=s,
                               n_heads=N_HEADS, head_dim=HEAD_DIM)

    out_flat = pl.pallas_call(
        kernel,
        out_shape=jax.ShapeDtypeStruct((b * s, d), out_dtype),
        grid_spec=pltpu.PrefetchScalarGridSpec(
            num_scalar_prefetch=0,
            grid=(b // bb,),
            in_specs=[
                pl.BlockSpec((rows, d), lambda i: (i, 0)),      # x rows (bf16)
                pl.BlockSpec((d, 3 * d), lambda i: (0, 0)),     # fused W_qkv
                pl.BlockSpec((1, 3 * d), lambda i: (0, 0)),     # fused b_qkv
                pl.BlockSpec((d, d), lambda i: (0, 0)),         # W_out
                pl.BlockSpec((1, d), lambda i: (0, 0)),         # b_out
            ],
            out_specs=pl.BlockSpec((rows, d), lambda i: (i, 0)),
        ),
        compiler_params=pltpu.CompilerParams(
            dimension_semantics=("parallel",),
            vmem_limit_bytes=_vmem_limit_bytes(rows, d, bb, N_HEADS, s)),
    )(x_flat, wqkv_bf, bqkv_f32, wo_bf, bo_f32)

    return out_flat.reshape(b, s, d)


def _reference(x, params):
    """Plain-JAX f32 reference mirroring the PyTorch forward."""
    b, s, d = x.shape
    h, hd = N_HEADS, HEAD_DIM
    q = x @ params["wq"] + params["bq"][0]
    k = x @ params["wk"] + params["bk"][0]
    v = x @ params["wv"] + params["bv"][0]
    q = q.reshape(b, s, h, hd).transpose(0, 2, 1, 3)
    k = k.reshape(b, s, h, hd).transpose(0, 2, 1, 3)
    v = v.reshape(b, s, h, hd).transpose(0, 2, 1, 3)
    a = jnp.einsum('bhqd,bhkd->bhqk', q, k) / math.sqrt(hd)
    a = jax.nn.softmax(a, axis=-1)
    ctx = jnp.einsum('bhqk,bhkd->bhqd', a, v)
    ctx = ctx.transpose(0, 2, 1, 3).reshape(b, s, d)
    return ctx @ params["wo"] + params["bo"][0]


def init_params(key, d_model):
    keys = jax.random.split(key, 8)
    bound = 1.0 / math.sqrt(d_model)   # PyTorch Linear default init range

    def w(k):
        return jax.random.uniform(k, (d_model, d_model), jnp.float32,
                                  minval=-bound, maxval=bound)

    def bvec(k):
        return jax.random.uniform(k, (1, d_model), jnp.float32,
                                  minval=-bound, maxval=bound)

    return {
        "wq": w(keys[0]), "bq": bvec(keys[1]),
        "wk": w(keys[2]), "bk": bvec(keys[3]),
        "wv": w(keys[4]), "bv": bvec(keys[5]),
        "wo": w(keys[6]), "bo": bvec(keys[7]),
    }


if __name__ == "__main__":
    key = jax.random.PRNGKey(0)
    k_x, k_p = jax.random.split(key)

    batch, seq_len = 4, 8
    x = jax.random.normal(k_x, (batch, seq_len, D_MODEL), jnp.float32)
    params = init_params(k_p, D_MODEL)

    out = attention_forward(x, params)
    out = jax.block_until_ready(out)

    ref = _reference(x, params)
    assert out.shape == (batch, seq_len, D_MODEL)
    # bf16 MXU operands (f32 accumulation) => ~1e-2-level agreement with the
    # pure-f32 reference; softmax itself is exact f32.
    assert jnp.allclose(out, ref, atol=3e-2, rtol=3e-2)

    print("KERNEL_OK")
</pallas_src>

<mosaic_0001>
module attributes {stable_mosaic.version = 11 : i64} {
  func.func @_attention_kernel(%arg0: i32, %arg1: memref<16x128xbf16, #tpu.memory_space<vmem>>, %arg2: memref<128x384xbf16, #tpu.memory_space<vmem>>, %arg3: memref<1x384xf32, #tpu.memory_space<vmem>>, %arg4: memref<128x128xbf16, #tpu.memory_space<vmem>>, %arg5: memref<1x128xf32, #tpu.memory_space<vmem>>, %arg6: memref<16x128xf32, #tpu.memory_space<vmem>>) attributes {dimension_semantics = [#tpu.dimension_semantics<parallel>], iteration_bounds = array<i64: 2>, scalar_prefetch = 0 : i64, scratch_operands = 0 : i64, tpu.core_type = #tpu.core_type<tc>, window_params = [{transform_indices = @transform_0, window_bounds = array<i64: 16, 128>}, {pipeline_mode = #tpu.pipeline_mode<synchronous>, transform_indices = @transform_1, window_bounds = array<i64: 128, 384>}, {pipeline_mode = #tpu.pipeline_mode<synchronous>, transform_indices = @transform_2, window_bounds = array<i64: 1, 384>}, {pipeline_mode = #tpu.pipeline_mode<synchronous>, transform_indices = @transform_3, window_bounds = array<i64: 128, 128>}, {pipeline_mode = #tpu.pipeline_mode<synchronous>, transform_indices = @transform_4, window_bounds = array<i64: 1, 128>}, {transform_indices = @transform_5, window_bounds = array<i64: 16, 128>}]} {
    %c0 = arith.constant 0 : index
    %c0_0 = arith.constant 0 : index
    %0 = vector.load %arg1[%c0, %c0_0] : memref<16x128xbf16, #tpu.memory_space<vmem>>, vector<16x128xbf16>
    %c0_1 = arith.constant 0 : index
    %c0_2 = arith.constant 0 : index
    %1 = vector.load %arg2[%c0_1, %c0_2] : memref<128x384xbf16, #tpu.memory_space<vmem>>, vector<128x384xbf16>
    %cst = arith.constant dense<0.000000e+00> : vector<16x384xf32>
    %2 = tpu.matmul %0, %1, %cst {dimension_numbers = #tpu.dot_dimension_numbers<[1], [0], [0], [1], [0, 0, 1, 1], [], []>} : vector<16x128xbf16>, vector<128x384xbf16>, vector<16x384xf32> -> vector<16x384xf32>
    %c0_3 = arith.constant 0 : index
    %c0_4 = arith.constant 0 : index
    %3 = vector.load %arg3[%c0_3, %c0_4] : memref<1x384xf32, #tpu.memory_space<vmem>>, vector<1x384xf32>
    %4 = vector.broadcast %3 : vector<1x384xf32> to vector<16x384xf32>
    %5 = arith.addf %2, %4 : vector<16x384xf32>
    %6 = vector.extract_strided_slice %5 {offsets = [0, 0], sizes = [16, 128], strides = [1, 1]} : vector<16x384xf32> to vector<16x128xf32>
    %7 = vector.extract_strided_slice %5 {offsets = [0, 128], sizes = [16, 128], strides = [1, 1]} : vector<16x384xf32> to vector<16x128xf32>
    %8 = vector.extract_strided_slice %5 {offsets = [0, 256], sizes = [16, 128], strides = [1, 1]} : vector<16x384xf32> to vector<16x128xf32>
    %9 = vector.shape_cast %6 : vector<16x128xf32> to vector<2x8x4x32xf32>
    %10 = tpu.transpose %9, [0, 2, 1, 3] : vector<2x8x4x32xf32> -> vector<2x4x8x32xf32>
    %11 = vector.shape_cast %10 : vector<2x4x8x32xf32> to vector<8x8x32xf32>
    %12 = arith.truncf %11 : vector<8x8x32xf32> to vector<8x8x32xbf16>
    %13 = vector.shape_cast %7 : vector<16x128xf32> to vector<2x8x4x32xf32>
    %14 = tpu.transpose %13, [0, 2, 1, 3] : vector<2x8x4x32xf32> -> vector<2x4x8x32xf32>
    %15 = vector.shape_cast %14 : vector<2x4x8x32xf32> to vector<8x8x32xf32>
    %16 = arith.truncf %15 : vector<8x8x32xf32> to vector<8x8x32xbf16>
    %17 = vector.shape_cast %8 : vector<16x128xf32> to vector<2x8x4x32xf32>
    %18 = tpu.transpose %17, [0, 2, 1, 3] : vector<2x8x4x32xf32> -> vector<2x4x8x32xf32>
    %19 = vector.shape_cast %18 : vector<2x4x8x32xf32> to vector<8x8x32xf32>
    %20 = arith.truncf %19 : vector<8x8x32xf32> to vector<8x8x32xbf16>
    "tpu.trace_start"() <{level = 10 : i32, message = "bqd,bkd->bqk"}> : () -> ()
    %cst_5 = arith.constant dense<0.000000e+00> : vector<8x8x8xf32>
    %21 = tpu.matmul %12, %16, %cst_5 {dimension_numbers = #tpu.dot_dimension_numbers<[2], [2], [1], [1], [0, 0, 0, 1, 1, 1], [0], [0]>} : vector<8x8x32xbf16>, vector<8x8x32xbf16>, vector<8x8x8xf32> -> vector<8x8x8xf32>
    "tpu.trace_stop"() : () -> ()
    %cst_6 = arith.constant dense<0xFF800000> : vector<8x8xf32>
    %22 = vector.multi_reduction <maximumf>, %21, %cst_6 [2] : vector<8x8x8xf32> to vector<8x8xf32>
    %23 = vector.shape_cast %22 : vector<8x8xf32> to vector<8x8x1xf32>
    %24 = vector.broadcast %23 : vector<8x8x1xf32> to vector<8x8x8xf32>
    %25 = arith.subf %21, %24 : vector<8x8x8xf32>
    %26 = math.exp %25 : vector<8x8x8xf32>
    %cst_7 = arith.constant dense<0.000000e+00> : vector<8x8xf32>
    %27 = vector.multi_reduction <add>, %26, %cst_7 [2] : vector<8x8x8xf32> to vector<8x8xf32>
    %28 = vector.shape_cast %27 : vector<8x8xf32> to vector<8x8x1xf32>
    %29 = vector.broadcast %28 : vector<8x8x1xf32> to vector<8x8x8xf32>
    %30 = arith.divf %26, %29 : vector<8x8x8xf32>
    %31 = arith.truncf %30 : vector<8x8x8xf32> to vector<8x8x8xbf16>
    "tpu.trace_start"() <{level = 10 : i32, message = "bqk,bkd->bqd"}> : () -> ()
    %cst_8 = arith.constant dense<0.000000e+00> : vector<8x8x32xf32>
    %32 = tpu.matmul %31, %20, %cst_8 {dimension_numbers = #tpu.dot_dimension_numbers<[2], [1], [1], [2], [0, 0, 0, 1, 1, 2], [0], [0]>} : vector<8x8x8xbf16>, vector<8x8x32xbf16>, vector<8x8x32xf32> -> vector<8x8x32xf32>
    "tpu.trace_stop"() : () -> ()
    %33 = vector.shape_cast %32 : vector<8x8x32xf32> to vector<2x4x8x32xf32>
    %34 = tpu.transpose %33, [0, 2, 1, 3] : vector<2x4x8x32xf32> -> vector<2x8x4x32xf32>
    %35 = vector.shape_cast %34 : vector<2x8x4x32xf32> to vector<16x128xf32>
    %36 = arith.truncf %35 : vector<16x128xf32> to vector<16x128xbf16>
    %c0_9 = arith.constant 0 : index
    %c0_10 = arith.constant 0 : index
    %37 = vector.load %arg4[%c0_9, %c0_10] : memref<128x128xbf16, #tpu.memory_space<vmem>>, vector<128x128xbf16>
    %cst_11 = arith.constant dense<0.000000e+00> : vector<16x128xf32>
    %38 = tpu.matmul %36, %37, %cst_11 {dimension_numbers = #tpu.dot_dimension_numbers<[1], [0], [0], [1], [0, 0, 1, 1], [], []>} : vector<16x128xbf16>, vector<128x128xbf16>, vector<16x128xf32> -> vector<16x128xf32>
    %c0_12 = arith.constant 0 : index
    %c0_13 = arith.constant 0 : index
    %39 = vector.load %arg5[%c0_12, %c0_13] : memref<1x128xf32, #tpu.memory_space<vmem>>, vector<1x128xf32>
    %40 = vector.broadcast %39 : vector<1x128xf32> to vector<16x128xf32>
    %41 = arith.addf %38, %40 : vector<16x128xf32>
    %c0_14 = arith.constant 0 : index
    %c0_15 = arith.constant 0 : index
    %42 = vector.load %arg6[%c0_14, %c0_15] : memref<16x128xf32, #tpu.memory_space<vmem>>, vector<16x128xf32>
    tpu.vector_store %arg6[%c0_14, %c0_15], %41 {strides = array<i32>} : memref<16x128xf32, #tpu.memory_space<vmem>>, vector<16x128xf32>,
    return
  }
  func.func @transform_0(%arg0: i32) -> (i32, i32) {
    %c0_i32 = arith.constant 0 : i32
    %c0_i32_0 = arith.constant 0 : i32
    return %arg0, %c0_i32 : i32, i32
  }
  func.func @transform_1(%arg0: i32) -> (i32, i32) {
    %c0_i32 = arith.constant 0 : i32
    %c0_i32_0 = arith.constant 0 : i32
    %c0_i32_1 = arith.constant 0 : i32
    return %c0_i32, %c0_i32_0 : i32, i32
  }
  func.func @transform_2(%arg0: i32) -> (i32, i32) {
    %c0_i32 = arith.constant 0 : i32
    %c0_i32_0 = arith.constant 0 : i32
    %c0_i32_1 = arith.constant 0 : i32
    return %c0_i32, %c0_i32_0 : i32, i32
  }
  func.func @transform_3(%arg0: i32) -> (i32, i32) {
    %c0_i32 = arith.constant 0 : i32
    %c0_i32_0 = arith.constant 0 : i32
    %c0_i32_1 = arith.constant 0 : i32
    return %c0_i32, %c0_i32_0 : i32, i32
  }
  func.func @transform_4(%arg0: i32) -> (i32, i32) {
    %c0_i32 = arith.constant 0 : i32
    %c0_i32_0 = arith.constant 0 : i32
    %c0_i32_1 = arith.constant 0 : i32
    return %c0_i32, %c0_i32_0 : i32, i32
  }
  func.func @transform_5(%arg0: i32) -> (i32, i32) {
    %c0_i32 = arith.constant 0 : i32
    %c0_i32_0 = arith.constant 0 : i32
    return %arg0, %c0_i32 : i32, i32
  }
}

</mosaic_0001>

<bundles_post_ra>
// kernel: tpu_custom_call.1
= control target key start
LH: loop header
LB: loop body
LE: loop exit
PB: predicated region body
PF: predicated region fallthrough
CT: control target
= control target key end

     0   :  { %10 = vsyncpa [#allocation3], 0  ;;  %s3585_s0 = inlined_call_operand.hbm [shape: bf16[32,128], index: 0, kind: input, shape index: {}]   ;;  %s3586_s1 = inlined_call_operand.hbm [shape: bf16[128,384], index: 1, kind: input, shape index: {}]   ;;  %s3587_s2 = inlined_call_operand.hbm [shape: f32[1,384], index: 2, kind: input, shape index: {}]   ;;  %s3588_s3 = inlined_call_operand.hbm [shape: bf16[128,128], index: 3, kind: input, shape index: {}]   ;;  %s3589_s4 = inlined_call_operand.vmem [shape: f32[1,128], index: 4, kind: input, shape index: {}]   ;;  %s3590_s5 = inlined_call_operand.hbm [shape: f32[32,128], index: 5, kind: output, shape index: {}]  }
   0x1   :  { %12 = vsyncpa [#allocation3 + $0x1], 0 }
   0x2   :  { %13 = vsyncpa [#allocation6], 0 }
   0x3   :  { %14 = vsyncpa [#allocation9], 0 }
   0x4   :  { %15 = vsyncpa [#allocation4], 0 }
   0x5   :  { %17 = vsyncpa [#allocation4 + $0x1], 0  ;;  %s2805_s18 = smov 0   ;;  %s2807_s19 = smov 0  }
   0x6   :  { %s2809_s20 = smov 0   ;;  %s2811_s21 = smov 0  }
   0x7 LB: > { %s2826_s22 = sadd.s32 4294967295, %s2759_s21   ;;  %s2221_s23 = sadd.s32 4294967294, %s2759_s21   ;;  %s2759_s21 = sphi %s2811_s21, %s3603_s21   ;;  %s2755_s20 = sphi %s2809_s20, %s3602_s20   ;;  %s2751_s19 = sphi %s2807_s19, %s3601_s19   ;;  %s2747_s18 = sphi %s2805_s18, %s3600_s18  }
   0x8   : > { %p43_p0 = scmp.ne.s32.totalorder %s2751_s19, %s2747_s18  ;;  %p44_p1 = scmp.eq.s32.totalorder %s2826_s22, 0 }
   0x9   : > { %p151_p2 = scmp.eq.s32.totalorder %s2826_s22, 1  ;;  %p157_p3 = scmp.eq.s32.totalorder %s2221_s23, 1 }
   0xa   : > { %p2835_p4 = por %p44_p1, %p43_p0  ;;  %p2222_p5 = scmp.ge.s32.totalorder %s2759_s21, 1 }
   0xb   : > { %p2840_p6 = por %p157_p3, %p43_p0  ;;  %p164_p7 = scmp.lt.s32.totalorder %s2759_s21, 3 }
   0xc   : > { %s175_s28 = sshll.u32 %s3586_s1, 4  ;;  %s2761_s30 = smov [#allocation5]   ;;  %s176_s28 = int_to_ptr.hbm [resolvable:$true] %s175_s28 }
   0xd   : > { %p2848_p8 = pnand %p2222_p5, %p164_p7  ;;  %s177_s6 = sshll.u32 %s2761_s30, 4  ;;  %s178_s6 = int_to_ptr.vmem [resolvable:$true] %s177_s6 }
   0xe   : > { %s190_s10 = sshll.u32 %s3587_s2, 4  ;;  %s2762_s11 = smov 192   ;;  %s191_s10 = int_to_ptr.hbm [resolvable:$true] %s190_s10 }
   0xf   : > { %p2440_p9 = pneg %p2848_p8  ;;  %s2763_s12 = smov 12  }
  0x10   : > { %s2764_s13 = smov [#allocation7]   ;;  %s201_s17 = sshll.u32 %s3588_s3, 4  ;;  %s202_s17 = int_to_ptr.hbm [resolvable:$true] %s201_s17 }
  0x11   : > { %p2856_p10 = pnand %p2440_p9, %p44_p1  ;;  %s192_s14 = sshll.u32 %s2764_s13, 4  ;;  %s193_s14 = int_to_ptr.vmem [resolvable:$true] %s192_s14 }
  0x12   : > { %s2765_s23 = smov [#allocation8]   ;;  %s3591_s27 = smov 64  }
  0x13   : > { %2443 = dma.hbm_to_vmem [thread:$0]  (!%p2856_p10), %s176_s28, 3072, %s178_s6, [#allocation6], %s2762_s11, %s2762_s11, %s2763_s12  }
  0x14   : > { %2446 = dma.hbm_to_vmem [thread:$0]  (!%p2856_p10), %s191_s10, 48, %s193_s14, [#allocation6]  }
  0x15   : > { %s203_s26 = sshll.u32 %s2765_s23, 4  ;;  %s2767_s28 = smov 4   ;;  %s204_s26 = int_to_ptr.vmem [resolvable:$true] %s203_s26 }
  0x16   : > { %2449 = dma.hbm_to_vmem [thread:$0]  (!%p2856_p10), %s202_s17, 1024, %s204_s26, [#allocation9], %s3591_s27, %s3591_s27, %s2767_s28  }
  0x17   : > { %s2877_s30 = sadd.s32 1, %s2759_s21   ;;  %s30_s8 = sadd.s32 1, %s2755_s20 }
  0x18   : > { %s27_s6 = ssub.s32 %s2759_s21, %s2877_s30  ;;  %p37_p13 = scmp.ne.s32.totalorder %s2755_s20, %s2751_s19 }
  0x19   : > { %p28_p12 = scmp.eq.s32.totalorder %s27_s6, 0  ;;  %p38_p0 = scmp.eq.s32.totalorder %s2759_s21, 0 }
  0x1a   : > { %p2890_p3 = por %p151_p2, %p37_p13  ;;  %p2461_p5 = scmp.lt.s32.totalorder %s2759_s21, 2 }
  0x1b   : > { %s2886_s9 = scalar_select %p28_p12, %s2755_s20, %s30_s8  }
  0x1c   : > { %s220_s7 = sand.u32 1, %s2755_s20   ;;  %s2389_s11 = sshll.u32 %s2759_s21, 3 }
  0x1d   : > { %p39_p7 = por %p38_p0, %p37_p13  ;;  %s2227_s12 = sshll.u32 %s220_s7, 3 }
  0x1e   : > { %s229_s15 = scalar_lea.hbm %s3585_s0, %s2389_s11  ;;  %s224_s17 = scalar_lea.vmem [#allocation2], %s2227_s12 }
  0x1f   : > { %s230_s16 = sshll.u32 %s229_s15, 4  ;;  %s232_s23 = sshll.u32 %s224_s17, 4  ;;  %s231_s16 = int_to_ptr.hbm [resolvable:$true] %s230_s16  ;;  %s233_s23 = int_to_ptr.vmem [resolvable:$true] %s232_s23 }
  0x20   : > { %p2900_p9 = pnand %p2461_p5, %p39_p7  ;;  %s221_s6 = scalar_lea.sflag [#allocation3], %s220_s7 }
  0x21   : > { %s2655_s8 = sshra.s32 %s231_s16, 4  ;;  %s2662_s12 = scalar_lea.hbm %s3585_s0, 16  ;;  %s2656_s8 = int_to_ptr.hbm [resolvable:$true] %s2655_s8 }
  0x22   : > { %s2657_s27 = scalar_lea.hbm %s2656_s8, 8  ;;  %p2659_p10 = pneg %p2900_p9 }
  0x23   : > { %p2658_p2 = scmp.ne.s32.totalorder %s2656_s8, %s2657_s27  ;;  %p2663_p0 = scmp.lt.s32.totalorder %s2656_s8, %s3585_s0 }
  0x24   : > { %p2664_p5 = scmp.lt.s32.totalorder %s2662_s12, %s2657_s27 }
  0x25   : > { %p2660_p12 = pnand %p2659_p10, %p2658_p2 }
  0x26   : > { %p2665_p7 = por %p2664_p5, %p2663_p0 }
  0x27   : > { %p2661_p13 = pneg %p2660_p12 }
  0x29   : > { %p2666_p11 = pnand %p2665_p7, %p2661_p13 }
  0x2b   : > { %2669 = shalt.err (!%p2666_p11)
}
  0x2c   : > { %s3598_s7 = smov 64   ;;  %244 = sbr.rel (%p2848_p8) target bundleno = 1296 (0x510), region = 40 }
  0x2d   : > { %2453 = dma.hbm_to_vmem [thread:$0]  (!%p2900_p9), %s231_s16, 128, %s233_s23, %s221_s6, %s3598_s7, %s3598_s7, %s2767_s28  }
  0x2e   : > { %s2920_s17 = sand.u32 (!%p2848_p8), 1, %s2751_s19  }
  0x2f   : > { %s2231_s8 = sshll.u32 (!%p2848_p8), %s2920_s17, 3  ;;  %s247_s27 = scalar_lea.sflag (!%p2848_p8), [#allocation3], %s2920_s17 }
  0x30   : > { %s2924_s11 = scalar_lea.vmem (!%p2848_p8), [#allocation2], %s2231_s8 }
  0x31   : > { %2730 = dma.done.wait (%p2835_p4), %s247_s27, 128  }
  0x32   : > { %2732 = vsyncadd (%p2835_p4), %s247_s27, 4294967168 }
  0x33   : > { %2734 = dma.done.wait (%p44_p1), [#allocation6], 3120  }
  0x34   : > { %2736 = vsyncadd (%p44_p1), [#allocation6], 4294964176 }
  0x35   : > { %2738 = dma.done.wait (%p44_p1), [#allocation9], 1024  }
  0x36   : > { %2740 = vsyncadd (%p44_p1), [#allocation9], 4294966272  ;;  %v2326_v0 = vld [vmem:[#allocation5 + $0xa8] sm:$0xf]  ;;  %v2413_v1 = vld [vmem:[#allocation5 + $0xb0] sm:$0xf0] }
  0x37   : > { %v2412_v2 = vld [vmem:[#allocation5 + $0xac] sm:$0xf]  ;;  %v2327_v3 = vor.u32 %v2413_v1, %v2326_v0  ;;  %v2328_v4 = vld [vmem:[#allocation5 + $0xb4] sm:$0xf0]  ;;  %v2314_v5 = vld [vmem:[#allocation5 + $0x90] sm:$0xf] }
  0x38   : > { %v2410_v6 = vld [vmem:[#allocation5 + $0x98] sm:$0xf0]  ;;  %v2331_v7 = vor.u32 %v2412_v2, %v2328_v4  ;;  %v2409_v8 = vld [vmem:[#allocation5 + $0x94] sm:$0xf]  ;;  %v2316_v9 = vld [vmem:[#allocation5 + $0x9c] sm:$0xf0] }
  0x39   : > { %472 = vmatpush.bf16.msra.mxu0 %v2327_v3  ;;  %v2315_v10 = vor.u32 %v2410_v6, %v2314_v5  ;;  %v2319_v11 = vor.u32 %v2409_v8, %v2316_v9  ;;  %v2302_v12 = vld [vmem:[#allocation5 + $0x78] sm:$0xf]  ;;  %v2407_v13 = vld [vmem:[#allocation5 + $0x80] sm:$0xf0]  ;;  %v2406_v14 = vld [vmem:[#allocation5 + $0x7c] sm:$0xf] }
  0x3a   : > { %486 = vmatpush.bf16.msra.mxu1 %v2331_v7  ;;  %v2304_v15 = vld [vmem:[#allocation5 + $0x84] sm:$0xf0]  ;;  %v2303_v16 = vor.u32 %v2407_v13, %v2302_v12  ;;  %v2290_v18 = vld [vmem:[#allocation5 + $0x60] sm:$0xf]  ;;  %v2404_v19 = vld [vmem:[#allocation5 + $0x68] sm:$0xf0] }
  0x3b   : > { %v2307_v17 = vor.u32 %v2406_v14, %v2304_v15  ;;  %v2403_v20 = vld [vmem:[#allocation5 + $0x64] sm:$0xf]  ;;  %v2292_v21 = vld [vmem:[#allocation5 + $0x6c] sm:$0xf0]  ;;  %v2291_v22 = vor.u32 %v2404_v19, %v2290_v18  ;;  %v2278_v24 = vld [vmem:[#allocation5 + $0x48] sm:$0xf] }
  0x3c   : > { %v2295_v23 = vor.u32 %v2403_v20, %v2292_v21  ;;  %v2401_v25 = vld [vmem:[#allocation5 + $0x50] sm:$0xf0]  ;;  %v2400_v26 = vld [vmem:[#allocation5 + $0x4c] sm:$0xf]  ;;  %v2280_v27 = vld [vmem:[#allocation5 + $0x54] sm:$0xf0] }
  0x3d   : > { %473 = vmatpush.bf16.msra.mxu0 %v2315_v10  ;;  %v2279_v28 = vor.u32 %v2401_v25, %v2278_v24  ;;  %v2283_v29 = vor.u32 %v2400_v26, %v2280_v27  ;;  %v2266_v30 = vld [vmem:[#allocation5 + $0x30] sm:$0xf]  ;;  %v2398_v31 = vld [vmem:[#allocation5 + $0x38] sm:$0xf0]  ;;  %v2397_v32 = vld [vmem:[#allocation5 + $0x34] sm:$0xf] }
  0x3e   : > { %487 = vmatpush.bf16.msra.mxu1 %v2319_v11  ;;  %v2268_v33 = vld [vmem:[#allocation5 + $0x3c] sm:$0xf0]  ;;  %v2267_v34 = vor.u32 %v2398_v31, %v2266_v30  ;;  %v2254_v36 = vld [vmem:[#allocation5 + $0x18] sm:$0xf]  ;;  %v2395_v37 = vld [vmem:[#allocation5 + $0x20] sm:$0xf0] }
  0x3f   : > { %v2271_v35 = vor.u32 %v2397_v32, %v2268_v33  ;;  %v2394_v38 = vld [vmem:[#allocation5 + $0x1c] sm:$0xf]  ;;  %v2256_v39 = vld [vmem:[#allocation5 + $0x24] sm:$0xf0]  ;;  %v2255_v40 = vor.u32 %v2395_v37, %v2254_v36  ;;  %v2242_v42 = vld [vmem:[#allocation5] sm:$0xf] }
  0x40   : > { %v2259_v41 = vor.u32 %v2394_v38, %v2256_v39  ;;  %v2392_v43 = vld [vmem:[#allocation5 + $0x8] sm:$0xf0]  ;;  %v2391_v44 = vld [vmem:[#allocation5 + $0x4] sm:$0xf]  ;;  %v2244_v45 = vld [vmem:[#allocation5 + $0xc] sm:$0xf0] }
  0x41   : > { %474 = vmatpush.bf16.msra.mxu0 %v2303_v16  ;;  %v2243_v46 = vor.u32 %v2392_v43, %v2242_v42  ;;  %v2247_v47 = vor.u32 %v2391_v44, %v2244_v45  ;;  %v2939_v48 = vld [vmem:[%s2924_s11] sm:$0xff]  ;;  %v2943_v49 = vld [vmem:[#allocation7] sm:$0x7]  ;;  %s2768_s24 = smov 64   ;;  %s2769_s29 = smov 32   ;;  %vm535_vm0 = vcmask 1047556  }
  0x42   : > { %488 = vmatpush.bf16.msra.mxu1 %v2307_v17  ;;  %v332_v50 = vperm.slane %v2943_v49, 0  ;;  %v333_v51 = vperm.slane %v2943_v49, 1  ;;  %s2770_s28 = smov 96   ;;  %v2334_v60 = vld [vmem:[#allocation5 + $0xb0] sm:$0xf]  ;;  %vm1259_vm1 = vcmask 261120  }
  0x43   : > { %v2414_v61 = vld [vmem:[#allocation5 + $0xb8] sm:$0xf0]  ;;  %v2322_v63 = vld [vmem:[#allocation5 + $0x98] sm:$0xf]  ;;  %v2411_v0 = vld [vmem:[#allocation5 + $0xa0] sm:$0xf0] }
  0x44   : > { %v2335_v62 = vor.u32 %v2414_v61, %v2334_v60  ;;  %v2323_v1 = vor.u32 %v2411_v0, %v2322_v63  ;;  %v2310_v2 = vld [vmem:[#allocation5 + $0x80] sm:$0xf]  ;;  %v2408_v3 = vld [vmem:[#allocation5 + $0x88] sm:$0xf0]  ;;  %v2298_v5 = vld [vmem:[#allocation5 + $0x68] sm:$0xf] }
  0x45   : > { %475 = vmatpush.bf16.msra.mxu0 %v2291_v22  ;;  %v2311_v4 = vor.u32 %v2408_v3, %v2310_v2  ;;  %v2405_v6 = vld [vmem:[#allocation5 + $0x70] sm:$0xf0]  ;;  %v2286_v9 = vld [vmem:[#allocation5 + $0x50] sm:$0xf]  ;;  %v2402_v10 = vld [vmem:[#allocation5 + $0x58] sm:$0xf0] }
  0x46   : > { %489 = vmatpush.bf16.msra.mxu1 %v2295_v23  ;;  %500 = vmatpush.bf16.msra.mxu2 %v2335_v62  ;;  %v2299_v7 = vor.u32 %v2405_v6, %v2298_v5  ;;  %v2287_v11 = vor.u32 %v2402_v10, %v2286_v9  ;;  %v2274_v13 = vld [vmem:[#allocation5 + $0x38] sm:$0xf]  ;;  %v2399_v14 = vld [vmem:[#allocation5 + $0x40] sm:$0xf0]  ;;  %v2771_v16 = vmov 1983009808  }
  0x47   : > { %v2275_v15 = vor.u32 %v2399_v14, %v2274_v13  ;;  %v540_v17 = vunpack.c.l.s4 %v2771_v16  ;;  %v2262_v23 = vld [vmem:[#allocation5 + $0x20] sm:$0xf]  ;;  %v2396_v24 = vld [vmem:[#allocation5 + $0x28] sm:$0xf0]  ;;  %v2772_v31 = vmov 1934713408  }
  0x48   : > { %v2263_v27 = vor.u32 %v2396_v24, %v2262_v23  ;;  %v564_v32 = vunpack.c.l.s4 %v2772_v31  ;;  %v2250_v36 = vld [vmem:[#allocation5 + $0x8] sm:$0xf]  ;;  %v2393_v37 = vld [vmem:[#allocation5 + $0x10] sm:$0xf0]  ;;  %vm1412_vm2 = vcmask 64512   ;;  %vm1616_vm3 = vcmask 1043456  }
  0x49   : > { %476 = vmatpush.bf16.msra.mxu0 %v2279_v28  ;;  %v2981_v28 = vunpack.c.0.s8 %v540_v17  ;;  %v2251_v42 = vor.u32 %v2393_v37, %v2250_v36  ;;  %s2235_s16 = sshll.u32 %s2920_s17, 4  ;;  %s2423_s6 = sshll.u32 %s2826_s22, 4 }
  0x4a   : > { %490 = vmatpush.bf16.msra.mxu1 %v2283_v29  ;;  %501 = vmatpush.bf16.msra.mxu2 %v2323_v1  ;;  %v2994_v44 = vunpack.c.0.s8 %v564_v32  ;;  %s292_s13 = scalar_lea.vmem [#allocation10], %s2235_s16  ;;  %s2115_s15 = scalar_lea.hbm %s3590_s5, %s2423_s6 }
  0x4b   : > { %s2116_s7 = sshll.u32 %s292_s13, 4  ;;  %s2118_s8 = sshll.u32 %s2115_s15, 4  ;;  %s2117_s7 = int_to_ptr.vmem [resolvable:$true] %s2116_s7  ;;  %s2119_s8 = int_to_ptr.hbm [resolvable:$true] %s2118_s8 }
  0x4c   : > { %s2104_s27 = scalar_lea.sflag [#allocation4], %s2920_s17  ;;  %s2699_s11 = sshra.s32 %s2119_s8, 4  ;;  %s2700_s11 = int_to_ptr.hbm [resolvable:$true] %s2699_s11 }
  0x4d   : > { %477 = vmatpush.bf16.msra.mxu0 %v2267_v34  ;;  %p2706_p11 = scmp.lt.s32.totalorder %s2700_s11, %s3590_s5 }
  0x4e   : > { %491 = vmatpush.bf16.msra.mxu1 %v2271_v35  ;;  %502 = vmatpush.bf16.msra.mxu2 %v2311_v4 }
  0x51   : > { %478 = vmatpush.bf16.msra.mxu0 %v2255_v40 }
  0x52   : > { %492 = vmatpush.bf16.msra.mxu1 %v2259_v41  ;;  %503 = vmatpush.bf16.msra.mxu2 %v2299_v7 }
  0x55   : > { %479 = vmatpush.bf16.msra.mxu0 %v2243_v46 }
  0x56   : > { %493 = vmatpush.bf16.msra.mxu1 %v2247_v47  ;;  %504 = vmatpush.bf16.msra.mxu2 %v2287_v11 }
  0x58   : > { %480 = vmatmul.bf16.vlgmr.msra.gmra.mxu0 %v2939_v48 }
  0x59   : > { %494 = vmatmul.bf16.vlgmr.msra.gmra.mxu1 %v2939_v48 }
  0x5a   : > { %505 = vmatpush.bf16.msra.mxu2 %v2275_v15 }
  0x5e   : > { %506 = vmatpush.bf16.msra.mxu2 %v2263_v27 }
  0x62   : > { %507 = vmatpush.bf16.msra.mxu2 %v2251_v42 }
  0x65   : > { %508 = vmatmul.bf16.vlgmr.msra.gmra.mxu2 %v2939_v48 }
  0xd5   : > { %v481_v52 = vpop.f32.mrf.mxu0 }
  0xd6   : > { %v2947_v53 = vadd.f32 %v481_v52, %v332_v50  ;;  %v495_v54 = vpop.f32.mrf.mxu1 }
  0xd7   : > { %v2949_v55 = vadd.f32 %v495_v54, %v333_v51 }
  0xd8   : > { %522 = vrot.lane.b32.xlu2 %v2947_v53, %s2768_s24  ;;  %v537_v25 = vrot.slane %v2947_v53, 4 }
  0xd9   : > { %777 = vrot.lane.b32.xlu1 %v2949_v55, %s2769_s29  ;;  %765 = vrot.lane.b32.xlu0 %v2949_v55, %s2770_s28  ;;  %v785_v35 = vrot.slane %v2949_v55, 4 }
  0xdd   : > { %v483_v58 = vpop.f32.mrf.mxu0 }
  0xde   : > { %v497_v56 = vpop.f32.mrf.mxu1  ;;  %v2971_v59 = vadd.f32 %v483_v58, %v332_v50 }
  0xdf   : > { %v2963_v57 = vadd.f32 %v497_v56, %v333_v51 }
  0xe0   : > { %528 = vrot.lane.b32.xlu2 %v2947_v53, %s2769_s29 }
  0xe1   : > { %771 = vrot.lane.b32.xlu0 %v2949_v55, %s2768_s24  ;;  %516 = vrot.lane.b32.xlu1 %v2947_v53, %s2770_s28  ;;  %v841_v32 = vrot.slane %v2963_v57, 4 }
  0xe8   : > { %779 = vrot.lane.b32.xlu2 %v2963_v57, %s2769_s29 }
  0xe9   : > { %767 = vrot.lane.b32.xlu0 %v2963_v57, %s2770_s28  ;;  %773 = vrot.lane.b32.xlu1 %v2963_v57, %s2768_s24 }
  0xf0   : > { %530 = vrot.lane.b32.xlu2 %v2971_v59, %s2769_s29 }
  0xf1   : > { %518 = vrot.lane.b32.xlu0 %v2971_v59, %s2770_s28  ;;  %524 = vrot.lane.b32.xlu1 %v2971_v59, %s2768_s24 }
 0x132   : > { %v523_v8 = vpop.permute.xlu2 %522 }
 0x133   : > { %v534_v18 = vrot.slane %v523_v8, 4  ;;  %v538_v33 = vsel %vm535_vm0, %v523_v8, %v537_v25 }
 0x134   : > { %v546_v43 = vperm.slane %v538_v33, %v2981_v28 }
 0x135   : > { %v536_v29 = vsel %vm535_vm0, %v534_v18, %v2947_v53 }
 0x136   : > { %v542_v38 = vperm.slane %v536_v29, %v2981_v28  ;;  %v573_v3 = vrot.slane %v546_v43, 4 }
 0x138   : > { %v561_v58 = vrot.slane %v542_v38, 4 }
 0x13a   : > { %v529_v12 = vpop.permute.xlu2 %528 }
 0x13b   : > { %v547_v39 = vrot.slane %v529_v12, 4 }
 0x142   : > { %v2990_v40 = vpop.permute.xlu2 %779 }
 0x143   : > { %v851_v33 = vrot.slane %v2990_v40, 4 }
 0x14b   : > { %v778_v19 = vpop.permute.xlu1 %777  ;;  %v766_v20 = vpop.permute.xlu0 %765 }
 0x14c   : > { %v795_v21 = vrot.slane %v778_v19, 4  ;;  %v797_v22 = vrot.slane %v766_v20, 4 }
 0x14e   : > { %v798_v26 = vsel %vm535_vm0, %v778_v19, %v797_v22  ;;  %v796_v30 = vsel %vm535_vm0, %v795_v21, %v766_v20  ;;  %v531_v19 = vpop.permute.xlu2 %530 }
 0x14f   : > { %v806_v34 = vperm.slane %v798_v26, %v2981_v28  ;;  %v802_v41 = vperm.slane %v796_v30, %v2981_v28 }
 0x151   : > { %v819_v53 = vrot.slane %v806_v34, 4  ;;  %v807_v60 = vrot.slane %v802_v41, 4 }
 0x153   : > { %v772_v45 = vpop.permute.xlu0 %771  ;;  %v517_v46 = vpop.permute.xlu1 %516 }
 0x154   : > { %v783_v47 = vrot.slane %v772_v45, 4  ;;  %v786_v50 = vsel %vm535_vm0, %v772_v45, %v785_v35  ;;  %v548_v51 = vsel %vm535_vm0, %v547_v39, %v517_v46  ;;  %v549_v52 = vrot.slane %v517_v46, 4 }
 0x155   : > { %v794_v54 = vperm.slane %v786_v50, %v2981_v28  ;;  %v554_v56 = vperm.slane %v548_v51, %v2981_v28 }
 0x156   : > { %v784_v61 = vsel %vm535_vm0, %v783_v47, %v2949_v55  ;;  %v550_v62 = vsel %vm535_vm0, %v529_v12, %v549_v52  ;;  %v593_v12 = vrot.slane %v2971_v59, 4 }
 0x157   : > { %v790_v63 = vperm.slane %v784_v61, %v2981_v28  ;;  %v820_v0 = vsel %vm535_vm0, %v819_v53, %v794_v54  ;;  %v821_v1 = vrot.slane %v794_v54, 4  ;;  %v558_v2 = vperm.slane %v550_v62, %v2981_v28 }
 0x158   : > { %v826_v4 = vperm.slane %v820_v0, %v2994_v44  ;;  %v559_v5 = vrot.slane %v554_v56, 4  ;;  %v562_v6 = vsel %vm535_vm0, %v554_v56, %v561_v58 }
 0x159   : > { %v808_v7 = vsel %vm535_vm0, %v807_v60, %v790_v63  ;;  %v809_v55 = vrot.slane %v790_v63, 4  ;;  %v822_v8 = vsel %vm535_vm0, %v806_v34, %v821_v1  ;;  %v570_v9 = vperm.slane %v562_v6, %v2994_v44 }
 0x15a   : > { %v3013_v10 = vperm.slane %v808_v7, %v2994_v44  ;;  %v830_v11 = vperm.slane %v822_v8, %v2994_v44  ;;  %v560_v48 = vsel %vm535_vm0, %v559_v5, %v542_v38  ;;  %v571_v15 = vrot.slane %v558_v2, 4 }
 0x15b   : > { %v810_v13 = vsel %vm535_vm0, %v802_v41, %v809_v55  ;;  %v566_v14 = vperm.slane %v560_v48, %v2994_v44  ;;  %v574_v16 = vsel %vm535_vm0, %v558_v2, %v573_v3  ;;  %v768_v17 = vpop.permute.xlu0 %767  ;;  %v774_v18 = vpop.permute.xlu1 %773  ;;  %v835_v22 = vrot.slane %v826_v4, 4 }
 0x15c   : > { %v818_v20 = vperm.slane %v810_v13, %v2994_v44  ;;  %v831_v21 = vrot.slane %v3013_v10, 4  ;;  %v837_v23 = vrot.slane %v830_v11, 4  ;;  %v572_v24 = vsel %vm535_vm0, %v571_v15, %v546_v43 }
 0x15d   : > { %v582_v25 = vperm.slane %v574_v16, %v2994_v44  ;;  %v583_v26 = vrot.slane %v566_v14, 4  ;;  %v585_v27 = vrot.slane %v570_v9, 4  ;;  %v603_v34 = vrot.slane %v531_v19, 4 }
 0x15e   : > { %v3025_v29 = vrot.slane %v818_v20, 4  ;;  %v838_v30 = vsel %vm535_vm0, 0.0, %v837_v23  ;;  %v906_v31 = vsel %vm535_vm0, %v837_v23, %v826_v4  ;;  %v3032_v36 = vperm.slane %v572_v24, %v2994_v44 }
 0x15f   : > { %v911_v35 = vrot.slane %v838_v30, 4  ;;  %v3035_v37 = vsel %vm535_vm0, 0.0, %v831_v21  ;;  %v836_v39 = vsel %vm535_vm0, 0.0, %v835_v22  ;;  %v3043_v41 = vsel %vm535_vm0, 0.0, %v585_v27 }
 0x160   : > { %v3039_v38 = vsel %vm535_vm0, 0.0, %v3025_v29  ;;  %v3046_v42 = vperm.slane %v906_v31, %v2981_v28  ;;  %v584_v45 = vsel %vm535_vm0, 0.0, %v583_v26  ;;  %v3050_v46 = vrot.slane %v582_v25, 4 }
 0x161   : > { %v912_v43 = vsel %vm535_vm0, %v911_v35, %v836_v39  ;;  %v900_v47 = vrot.slane %v3039_v38, 4  ;;  %v3054_v50 = vsel %vm535_vm0, %v585_v27, %v566_v14  ;;  %v852_v51 = vsel %vm535_vm0, %v851_v33, %v768_v17 }
 0x162   : > { %v853_v52 = vrot.slane %v768_v17, 4  ;;  %v3058_v53 = vperm.slane %v912_v43, %v2981_v28  ;;  %v587_v54 = vrot.slane %v3032_v36, 4  ;;  %v652_v56 = vrot.slane %v3043_v41, 4 }
 0x163   : > { %v858_v58 = vperm.slane %v852_v51, %v2981_v28  ;;  %v519_v60 = vpop.permute.xlu0 %518  ;;  %v525_v61 = vpop.permute.xlu1 %524  ;;  %v839_v63 = vrot.slane %v774_v18, 4  ;;  %v842_v0 = vsel %vm535_vm0, %v774_v18, %v841_v32  ;;  %v3084_v20 = vsel %vm535_vm0, 0.0, %v3050_v46 }
 0x164   : > { %v854_v62 = vsel %vm535_vm0, %v2990_v40, %v853_v52  ;;  %v604_v1 = vsel %vm535_vm0, %v603_v34, %v519_v60  ;;  %v850_v4 = vperm.slane %v842_v0, %v2981_v28  ;;  %v605_v5 = vrot.slane %v519_v60, 4 }
 0x165   : > { %v862_v2 = vperm.slane %v854_v62, %v2981_v28  ;;  %v863_v3 = vrot.slane %v858_v58, 4  ;;  %v840_v6 = vsel %vm535_vm0, %v839_v63, %v2963_v57  ;;  %v610_v7 = vperm.slane %v604_v1, %v2981_v28 }
 0x166   : > { %v591_v55 = vrot.slane %v525_v61, 4  ;;  %v594_v8 = vsel %vm535_vm0, %v525_v61, %v593_v12  ;;  %v846_v9 = vperm.slane %v840_v6, %v2981_v28  ;;  %v877_v11 = vrot.slane %v850_v4, 4 }
 0x167   : > { %v875_v40 = vrot.slane %v862_v2, 4  ;;  %v606_v48 = vsel %vm535_vm0, %v531_v19, %v605_v5  ;;  %v615_v14 = vrot.slane %v610_v7, 4  ;;  %v602_v16 = vperm.slane %v594_v8, %v2981_v28 }
 0x168   : > { %v614_v13 = vperm.slane %v606_v48, %v2981_v28  ;;  %v592_v15 = vsel %vm535_vm0, %v591_v55, %v2971_v59  ;;  %v864_v57 = vsel %vm535_vm0, %v863_v3, %v846_v9  ;;  %v865_v17 = vrot.slane %v846_v9, 4 }
 0x169   : > { %v876_v18 = vsel %vm535_vm0, %v875_v40, %v850_v4  ;;  %v878_v12 = vsel %vm535_vm0, %v862_v2, %v877_v11  ;;  %v3090_v23 = vperm.slane %v864_v57, %v2994_v44  ;;  %v598_v24 = vperm.slane %v592_v15, %v2981_v28 }
 0x16a   : > { %v882_v19 = vperm.slane %v876_v18, %v2994_v44  ;;  %v886_v21 = vperm.slane %v878_v12, %v2994_v44  ;;  %v627_v22 = vrot.slane %v614_v13, 4  ;;  %v866_v59 = vsel %vm535_vm0, %v858_v58, %v865_v17 }
 0x16b   : > { %v629_v25 = vrot.slane %v602_v16, 4  ;;  %v3094_v26 = vsel %vm535_vm0, 0.0, %v587_v54  ;;  %v874_v27 = vperm.slane %v866_v59, %v2994_v44  ;;  %v616_v32 = vsel %vm535_vm0, %v615_v14, %v598_v24 }
 0x16c   : > { %v891_v30 = vrot.slane %v882_v19, 4  ;;  %v893_v31 = vrot.slane %v886_v21, 4  ;;  %v617_v33 = vrot.slane %v598_v24, 4  ;;  %v628_v34 = vsel %vm535_vm0, %v627_v22, %v602_v16 }
 0x16d   : > { %v895_v35 = vsel %vm535_vm0, %v3025_v29, %v3013_v10  ;;  %v3102_v39 = vrot.slane %v874_v27, 4  ;;  %v630_v51 = vsel %vm535_vm0, %v614_v13, %v629_v25  ;;  %v887_v52 = vrot.slane %v3090_v23, 4 }
 0x16e   : > { %v892_v41 = vsel %vm535_vm0, 0.0, %v891_v30  ;;  %v894_v43 = vsel %vm535_vm0, 0.0, %v893_v31  ;;  %v618_v58 = vsel %vm535_vm0, %v610_v7, %v617_v33  ;;  %v622_v60 = vperm.slane %v616_v32, %v2994_v44 }
 0x16f   : > { %v965_v54 = vrot.slane %v894_v43, 4  ;;  %v653_v61 = vsel %vm535_vm0, %v652_v56, %v584_v45  ;;  %v663_v62 = vrot.slane %v3084_v20, 4  ;;  %v626_v10 = vperm.slane %v618_v58, %v2994_v44 }
 0x170   : > { %v634_v29 = vperm.slane %v628_v34, %v2994_v44  ;;  %v3116_v63 = vsel %vm535_vm0, 0.0, %v3102_v39  ;;  %v960_v0 = vsel %vm535_vm0, %v893_v31, %v882_v19  ;;  %v638_v2 = vperm.slane %v630_v51, %v2994_v44 }
 0x171   : > { %v966_v1 = vsel %vm535_vm0, %v965_v54, %v892_v41  ;;  %v639_v3 = vrot.slane %v622_v60, 4  ;;  %v641_v4 = vrot.slane %v626_v10, 4  ;;  %v899_v45 = vperm.slane %v895_v35, %v2981_v28 }
 0x172   : > { %v643_v5 = vrot.slane %v634_v29, 4  ;;  %v3123_v56 = vsel %vm535_vm0, 0.0, %v887_v52  ;;  %v645_v6 = vrot.slane %v638_v2, 4  ;;  %v901_v7 = vsel %vm535_vm0, %v900_v47, %v3035_v37 }
 0x173   : > { %v929_v55 = vrot.slane %v3058_v53, 4  ;;  %v954_v8 = vrot.slane %v3116_v63, 4  ;;  %v3132_v40 = vperm.slane %v960_v0, %v2981_v28  ;;  %v3135_v9 = vperm.slane %v966_v1, %v2981_v28 }
 0x174   : > { %v905_v11 = vperm.slane %v901_v7, %v2981_v28  ;;  %v3139_v48 = vsel %vm535_vm0, 0.0, %v641_v4  ;;  %v646_v13 = vsel %vm535_vm0, 0.0, %v645_v6  ;;  %v712_v38 = vsel %vm535_vm0, %v645_v6, %v634_v29 }
 0x175   : > { %v919_v37 = vrot.slane %v899_v45, 4  ;;  %v3144_v47 = vsel %vm535_vm0, 0.0, %v639_v3  ;;  %v644_v14 = vsel %vm535_vm0, 0.0, %v643_v5  ;;  %v930_v16 = vsel %vm535_vm0, %v929_v55, %v3046_v42 }
 0x176   : > { %v917_v15 = vrot.slane %v905_v11, 4  ;;  %v3150_v57 = vsel %vm535_vm0, %v641_v4, %v622_v60  ;;  %v717_v17 = vrot.slane %v646_v13, 4  ;;  %v936_v18 = vperm.slane %v930_v16, %v2994_v44 }
 0x177   : > { %v920_v12 = vsel %vm535_vm0, %v905_v11, %v919_v37  ;;  %v706_v20 = vrot.slane %v3139_v48, 4  ;;  %v3156_v19 = vperm.slane %v712_v38, %v2981_v28  ;;  %v931_v25 = vrot.slane %v3046_v42, 4 }
 0x178   : > { %v918_v21 = vsel %vm535_vm0, %v917_v15, %v899_v45  ;;  %v928_v22 = vperm.slane %v920_v12, %v2994_v44  ;;  %v941_v24 = vrot.slane %v936_v18, 4  ;;  %v651_v30 = vperm.slane %v3054_v50, %v2981_v28 }
 0x179   : > { %v924_v59 = vperm.slane %v918_v21, %v2994_v44  ;;  %v657_v31 = vperm.slane %v653_v61, %v2981_v28  ;;  %v658_v32 = vsel %vm535_vm0, %v3050_v46, %v3032_v36  ;;  %v718_v33 = vsel %vm535_vm0, %v717_v17, %v644_v14 }
 0x17a   : > { %v947_v27 = vrot.slane %v928_v22, 4  ;;  %v932_v35 = vsel %vm535_vm0, %v3058_v53, %v931_v25  ;;  %v662_v51 = vperm.slane %v658_v32, %v2981_v28  ;;  %v664_v50 = vsel %vm535_vm0, %v663_v62, %v3094_v26 }
 0x17b   : > { %v942_v34 = vsel %vm535_vm0, %v941_v24, %v924_v59  ;;  %v943_v41 = vrot.slane %v924_v59, 4  ;;  %v940_v42 = vperm.slane %v932_v35, %v2994_v44  ;;  %v668_v36 = vperm.slane %v664_v50, %v2981_v28 }
 0x17c   : > { %v1003_v43 = vpack.c.bf16 %v942_v34, %v942_v34  ;;  %v669_v46 = vrot.slane %v657_v31, 4  ;;  %v671_v54 = vrot.slane %v651_v30, 4  ;;  %v3183_v26 = vperm.slane %v718_v33, %v2981_v28 }
 0x17d   : > { %v944_v52 = vsel %vm535_vm0, %v936_v18, %v943_v41  ;;  %v945_v60 = vrot.slane %v940_v42, 4  ;;  %v948_v53 = vsel %vm535_vm0, %v940_v42, %v947_v27  ;;  %v681_v0 = vrot.slane %v668_v36, 4 }
 0x17e   : > { %v1264_v58 = vsel %vm1259_vm1, %v1003_v43, 0  ;;  %v1004_v61 = vpack.c.bf16 %v944_v52, %v944_v52  ;;  %v1006_v10 = vpack.c.bf16 %v948_v53, %v948_v53  ;;  %v670_v29 = vsel %vm535_vm0, %v669_v46, %v651_v30 }
 0x17f   : > { %1273 = vmatpush.bf16.xpose.msra.mxu3 %v1264_v58  ;;  %v672_v1 = vsel %vm535_vm0, %v657_v31, %v671_v54  ;;  %v683_v3 = vrot.slane %v662_v51, 4  ;;  %v682_v5 = vsel %vm535_vm0, %v681_v0, %v662_v51  ;;  %v946_v45 = vsel %vm535_vm0, %v945_v60, %v928_v22 }
 0x180   : > { %v1283_v62 = vsel %vm1259_vm1, %v1004_v61, 0  ;;  %v3187_v2 = vperm.slane %v672_v1, %v2994_v44  ;;  %v1321_v4 = vsel %vm1259_vm1, %v1006_v10, 0  ;;  %v949_v6 = vsel %vm535_vm0, %v3102_v39, %v3090_v23 }
 0x181   : > { %1330 = vmatpush.bf16.xpose.msrb.mxu0 %v1321_v4  ;;  %v3196_v7 = vperm.slane %v670_v29, %v2994_v44  ;;  %v3199_v55 = vperm.slane %v682_v5, %v2994_v44  ;;  %v684_v11 = vsel %vm535_vm0, %v668_v36, %v683_v3  ;;  %v1005_v38 = vpack.c.bf16 %v946_v45, %v946_v45 }
 0x182   : > { %v699_v48 = vrot.slane %v3187_v2, 4  ;;  %v3204_v13 = vperm.slane %v684_v11, %v2994_v44  ;;  %v953_v37 = vperm.slane %v949_v6, %v2981_v28  ;;  %v955_v23 = vsel %vm535_vm0, %v954_v8, %v3123_v56 }
 0x183   : > { %v693_v39 = vrot.slane %v3199_v55, 4  ;;  %v959_v14 = vperm.slane %v955_v23, %v2981_v28  ;;  %v983_v15 = vrot.slane %v3135_v9, 4  ;;  %v985_v16 = vrot.slane %v3132_v40, 4 }
 0x184   : > { %v707_v17 = vsel %vm535_vm0, %v706_v20, %v3144_v47  ;;  %v735_v18 = vrot.slane %v3183_v26, 4  ;;  %v700_v12 = vsel %vm535_vm0, %v3204_v13, %v699_v48  ;;  %v973_v21 = vrot.slane %v953_v37, 4 }
 0x185   : > { %v694_v63 = vsel %vm535_vm0, %v693_v39, %v3196_v7  ;;  %v758_v56 = vpack.c.bf16 %v700_v12, %v700_v12  ;;  %v971_v8 = vrot.slane %v959_v14, 4  ;;  %v984_v22 = vsel %vm535_vm0, %v983_v15, %v3132_v40 }
 0x186   : > { %v755_v59 = vpack.c.bf16 %v694_v63, %v694_v63  ;;  %v990_v24 = vperm.slane %v984_v22, %v2994_v44  ;;  %v974_v25 = vsel %vm535_vm0, %v959_v14, %v973_v21  ;;  %v986_v47 = vsel %vm535_vm0, %v3135_v9, %v985_v16 }
 0x187   : > { %1292 = vmatpush.bf16.xpose.msrb.mxu3 %v1283_v62  ;;  %v1302_v20 = vsel %vm1259_vm1, %v1005_v38, 0  ;;  %v972_v27 = vsel %vm535_vm0, %v971_v8, %v953_v37  ;;  %v982_v30 = vperm.slane %v974_v25, %v2994_v44  ;;  %v705_v31 = vperm.slane %v3150_v57, %v2981_v28 }
 0x188   : > { %2336 = vmatmul.msk.bf16.vlgmr.msra.gmra.mxu3 %vm1259_vm1, %v755_v59  ;;  %2339 = vmatmul.msk.bf16.vlgmr.msrb.gmra.mxu0 %vm1259_vm1, %v758_v56  ;;  %v978_v40 = vperm.slane %v972_v27, %v2994_v44  ;;  %v995_v32 = vrot.slane %v990_v24, 4  ;;  %v711_v33 = vperm.slane %v707_v17, %v2981_v28  ;;  %v736_v9 = vsel %vm535_vm0, %v735_v18, %v3156_v19  ;;  %v509_v56 = vpop.f32.mrf.mxu2 }
 0x189   : > { %v994_v34 = vperm.slane %v986_v47, %v2994_v44  ;;  %v1001_v35 = vrot.slane %v982_v30, 4  ;;  %v725_v41 = vrot.slane %v705_v31, 4  ;;  %v742_v43 = vperm.slane %v736_v9, %v2994_v44 }
 0x18a   : > { %v737_v57 = vrot.slane %v3156_v19, 4  ;;  %v996_v42 = vsel %vm535_vm0, %v995_v32, %v978_v40  ;;  %v997_v51 = vrot.slane %v978_v40, 4  ;;  %v723_v50 = vrot.slane %v711_v33, 4 }
 0x18b   : > { %v1007_v52 = vpack.c.bf16 %v996_v42, %v996_v42  ;;  %v1002_v36 = vsel %vm535_vm0, %v994_v34, %v1001_v35  ;;  %v747_v46 = vrot.slane %v742_v43, 4  ;;  %v726_v53 = vsel %vm535_vm0, %v711_v33, %v725_v41 }
 0x18c   : > { %v1010_v54 = vpack.c.bf16 %v1002_v36, %v1002_v36  ;;  %v998_v58 = vsel %vm535_vm0, %v990_v24, %v997_v51  ;;  %v724_v60 = vsel %vm535_vm0, %v723_v50, %v705_v31  ;;  %v999_v29 = vrot.slane %v994_v34, 4 }
 0x18d   : > { %v1340_v61 = vsel %vm1259_vm1, %v1007_v52, 0  ;;  %v1008_v10 = vpack.c.bf16 %v998_v58, %v998_v58  ;;  %v730_v19 = vperm.slane %v724_v60, %v2994_v44  ;;  %v734_v1 = vperm.slane %v726_v53, %v2994_v44 }
 0x18e   : > { %1349 = vmatpush.bf16.xpose.msrb.mxu2 %v1340_v61  ;;  %v1397_v0 = vsel %vm1259_vm1, %v1010_v54, 0  ;;  %v738_v62 = vsel %vm535_vm0, %v3183_v26, %v737_v57  ;;  %v695_v3 = vrot.slane %v3196_v7, 4  ;;  %v1000_v11 = vsel %vm535_vm0, %v999_v29, %v982_v30 }
 0x18f   : > { %1311 = vmatpush.bf16.xpose.msra.mxu3 %v1302_v20  ;;  %1406 = vmatpush.bf16.xpose.msra.mxu0 %v1397_v0  ;;  %v1359_v4 = vsel %vm1259_vm1, %v1008_v10, 0  ;;  %v748_v5 = vsel %vm535_vm0, %v747_v46, %v730_v19  ;;  %v753_v45 = vrot.slane %v734_v1, 4  ;;  %v746_v48 = vperm.slane %v738_v62, %v2994_v44 }
 0x190   : > { %v759_v6 = vpack.c.bf16 %v748_v5, %v748_v5  ;;  %v696_v38 = vsel %vm535_vm0, %v3199_v55, %v695_v3  ;;  %v1009_v26 = vpack.c.bf16 %v1000_v11, %v1000_v11  ;;  %v749_v14 = vrot.slane %v730_v19, 4 }
 0x191   : > { %v754_v37 = vsel %vm535_vm0, %v746_v48, %v753_v45  ;;  %v756_v7 = vpack.c.bf16 %v696_v38, %v696_v38  ;;  %v697_v15 = vrot.slane %v3204_v13, 4  ;;  %v751_v12 = vrot.slane %v746_v48, 4 }
 0x192   : > { %v762_v23 = vpack.c.bf16 %v754_v37, %v754_v37  ;;  %v1378_v39 = vsel %vm1259_vm1, %v1009_v26, 0  ;;  %v750_v16 = vsel %vm535_vm0, %v742_v43, %v749_v14  ;;  %v334_v9 = vperm.slane %v2943_v49, 2 }
 0x193   : > { %v760_v55 = vpack.c.bf16 %v750_v16, %v750_v16  ;;  %v698_v17 = vsel %vm535_vm0, %v697_v15, %v3187_v2  ;;  %v752_v21 = vsel %vm535_vm0, %v751_v12, %v734_v1  ;;  %v511_v2 = vpop.f32.mrf.mxu2 }
 0x194   : > { %v757_v18 = vpack.c.bf16 %v698_v17, %v698_v17  ;;  %v761_v63 = vpack.c.bf16 %v752_v21, %v752_v21  ;;  %v510_v35 = vadd.f32 %v509_v56, %v334_v9  ;;  %v3295_v52 = vadd.f32 %v511_v2, %v334_v9 }
 0x195   : > { %2340 = vmatmul.msk.bf16.vlgmr.msrb.gmra.mxu2 %vm1259_vm1, %v759_v6 }
 0x196   : > { %1368 = vmatpush.bf16.xpose.msra.mxu2 %v1359_v4  ;;  %v2512_v49 = vpack.i.bf16 %v3295_v52, %v510_v35 }
 0x198   : > { %2337 = vmatmul.msk.bf16.vlgmr.msrb.gmra.mxu3 %vm1259_vm1, %v756_v7  ;;  %2343 = vmatmul.msk.bf16.vlgmr.msra.gmra.mxu0 %vm1259_vm1, %v762_v23  ;;  %v1033_v7 = vrot.slane %v510_v35, 4 }
 0x199   : > { %1387 = vmatpush.bf16.xpose.msrb.mxu3 %v1378_v39 }
 0x1a5   : > { %2341 = vmatmul.msk.bf16.vlgmr.msra.gmra.mxu2 %vm1259_vm1, %v760_v55 }
 0x1a8   : > { %2338 = vmatmul.msk.bf16.vlgmr.msra.gmra.mxu3 %vm1259_vm1, %v757_v18 }
 0x1b8   : > { %2342 = vmatmul.msk.bf16.vlgmr.msrb.gmra.mxu3 %vm1259_vm1, %v761_v63 }
 0x205   : > { %v1332_v13 = vpop.f32.mrf.mxu0 }
 0x206   : > { %v1422_v8 = vsel %vm1412_vm2, %v1332_v13, -inf }
 0x207   : > { %1423 = vmax.xlane.f32.xlu2 %v1422_v8 }
 0x20b   : > { %v1275_v22 = vpop.f32.mrf.mxu3 }
 0x20c   : > { %v1413_v24 = vsel %vm1412_vm2, %v1275_v22, -inf }
 0x20d   : > { %v1334_v59 = vpop.f32.mrf.mxu0 }
 0x20f   : > { %1414 = vmax.xlane.f32.xlu2 %v1413_v24 }
 0x213   : > { %v1277_v25 = vpop.f32.mrf.mxu3 }
 0x215   : > { %v3275_v47 = vpop.f32.mrf.mxu0 }
 0x216   : > { %v1434_v20 = vsel %vm1412_vm2, %v3275_v47, -inf }
 0x217   : > { %1435 = vmax.xlane.f32.xlu0 %v1434_v20 }
 0x218   : > { %v3279_v27 = vpop.f32.mrf.mxu2 }
 0x219   : > { %v1425_v30 = vsel %vm1412_vm2, %v3279_v27, -inf }
 0x21a   : > { %1426 = vmax.xlane.f32.xlu2 %v1425_v30 }
 0x21b   : > { %v1294_v31 = vpop.f32.mrf.mxu3 }
 0x21c   : > { %v1416_v40 = vsel %vm1412_vm2, %v1294_v31, -inf }
 0x21d   : > { %v1410_v32 = vpop.f32.mrf.mxu0  ;;  %1417 = vmax.xlane.f32.xlu1 %v1416_v40 }
 0x220   : > { %v1353_v33 = vpop.f32.mrf.mxu2 }
 0x223   : > { %v1296_v34 = vpop.f32.mrf.mxu3 }
 0x228   : > { %v3285_v41 = vpop.f32.mrf.mxu2 }
 0x229   : > { %v1428_v43 = vsel %vm1412_vm2, %v3285_v41, -inf }
 0x22a   : > { %1429 = vmax.xlane.f32.xlu1 %v1428_v43 }
 0x22b   : > { %1025 = vrot.lane.b32.xlu0 %v510_v35, %s2769_s29  ;;  %v3290_v57 = vpop.f32.mrf.mxu3 }
 0x22c   : > { %v1419_v46 = vsel %vm1412_vm2, %v3290_v57, -inf }
 0x230   : > { %v1372_v42 = vpop.f32.mrf.mxu2 }
 0x232   : > { %1019 = vrot.lane.b32.xlu2 %v510_v35, %s2768_s24 }
 0x233   : > { %v1315_v51 = vpop.f32.mrf.mxu3 }
 0x23b   : > { %v3293_v50 = vpop.f32.mrf.mxu3 }
 0x23c   : > { %v1431_v54 = vsel %vm1412_vm2, %v3293_v50, -inf }
 0x243   : > { %2513 = vrot.lane.b32.xlu1 %v2512_v49, %s2770_s28  ;;  %v1391_v36 = vpop.f32.mrf.mxu3 }
 0x255   : > { %1420 = vmax.xlane.f32.xlu0 %v1419_v46 }
 0x25d   : > { %1432 = vmax.xlane.f32.xlu0 %v1431_v54 }
 0x27a   : > { %v1424_v58 = vpop.xlane.xlu2 %1423 }
 0x27b   : > { %v1440_v60 = vsub.f32 %v1332_v13, %v1424_v58 }
 0x27d   : > { %v1451_v53 = vmul.f32 1.442695, %v1440_v60 }
 0x27f   : > { %2533 = vpow2.f32 %v1451_v53 }
 0x282   : > { %v1415_v61 = vpop.xlane.xlu2 %1414 }
 0x283   : > { %v1437_v10 = vsub.f32 %v1275_v22, %v1415_v61 }
 0x285   : > { %v3303_v19 = vpop.eup %2533  ;;  %v1445_v29 = vmul.f32 1.442695, %v1437_v10 }
 0x286   : > { %v1470_v0 = vsel %vm1412_vm2, %v3303_v19, 0.0 }
 0x287   : > { %2535 = vpow2.f32 %v1445_v29  ;;  %1471 = vadd.xlane.f32.xlu1 %v1470_v0 }
 0x28a   : > { %v3319_v48 = vpop.xlane.xlu0 %1435 }
 0x28d   : > { %v3307_v1 = vpop.eup %2535  ;;  %v3315_v11 = vpop.xlane.xlu2 %1426 }
 0x28e   : > { %v1461_v62 = vsel %vm1412_vm2, %v3307_v1, 0.0 }
 0x28f   : > { %1462 = vadd.xlane.f32.xlu2 %v1461_v62 }
 0x290   : > { %v1418_v3 = vpop.xlane.xlu1 %1417 }
 0x291   : > { %v1438_v4 = vsub.f32 %v1294_v31, %v1418_v3 }
 0x293   : > { %v1447_v5 = vmul.f32 1.442695, %v1438_v4 }
 0x295   : > { %2537 = vpow2.f32 %v1447_v5  ;;  %v1020_v38 = vpop.permute.xlu2 %1019 }
 0x296   : > { %v1031_v26 = vrot.slane %v1020_v38, 4  ;;  %v1034_v14 = vsel %vm535_vm0, %v1020_v38, %v1033_v7 }
 0x297   : > { %v1042_v18 = vperm.slane %v1034_v14, %v2981_v28 }
 0x298   : > { %v1032_v23 = vsel %vm535_vm0, %v1031_v26, %v510_v35  ;;  %v1441_v26 = vsub.f32 %v3279_v27, %v3315_v11 }
 0x299   : > { %v1038_v15 = vperm.slane %v1032_v23, %v2981_v28  ;;  %v1069_v8 = vrot.slane %v1042_v18, 4 }
 0x29b   : > { %v3311_v45 = vpop.eup %2537  ;;  %v1057_v63 = vrot.slane %v1038_v15, 4 }
 0x29c   : > { %v1464_v6 = vsel %vm1412_vm2, %v3311_v45, 0.0 }
 0x29d   : > { %1465 = vadd.xlane.f32.xlu0 %v1464_v6  ;;  %v3321_v37 = vpop.xlane.xlu1 %1429  ;;  %v1026_v39 = vpop.permute.xlu0 %1025 }
 0x29e   : > { %v1043_v55 = vrot.slane %v1026_v39, 4 }
 0x2a7   : > { %1027 = vrot.lane.b32.xlu2 %v3295_v52, %s2769_s29 }
 0x2b1   : > { %1021 = vrot.lane.b32.xlu0 %v3295_v52, %s2768_s24 }
 0x2b5   : > { %v3328_v16 = vpop.permute.xlu1 %2513 }
 0x2b6   : > { %v2515_v17 = vunpack.i.l.bf16 %v3328_v16 }
 0x2b8   : > { %v1044_v12 = vsel %vm535_vm0, %v1043_v55, %v2515_v17  ;;  %v1045_v21 = vrot.slane %v2515_v17, 4 }
 0x2b9   : > { %v1050_v56 = vperm.slane %v1044_v12, %v2981_v28  ;;  %v1442_v12 = vsub.f32 %v3285_v41, %v3321_v37 }
 0x2ba   : > { %v1046_v13 = vsel %vm535_vm0, %v1026_v39, %v1045_v21 }
 0x2bb   : > { %v1054_v22 = vperm.slane %v1046_v13, %v2981_v28  ;;  %v1055_v59 = vrot.slane %v1050_v56, 4  ;;  %v1058_v2 = vsel %vm535_vm0, %v1050_v56, %v1057_v63  ;;  %v1455_v37 = vmul.f32 1.442695, %v1442_v12 }
 0x2bc   : > { %v1066_v24 = vperm.slane %v1058_v2, %v2994_v44 }
 0x2bd   : > { %v1056_v25 = vsel %vm535_vm0, %v1055_v59, %v1038_v15  ;;  %v1067_v20 = vrot.slane %v1054_v22, 4  ;;  %v1070_v30 = vsel %vm535_vm0, %v1054_v22, %v1069_v8 }
 0x2be   : > { %v1062_v31 = vperm.slane %v1056_v25, %v2994_v44  ;;  %v1078_v40 = vperm.slane %v1070_v30, %v2994_v44  ;;  %v1081_v32 = vrot.slane %v1066_v24, 4 }
 0x2bf   : > { %v1068_v33 = vsel %vm535_vm0, %v1067_v20, %v1042_v18 }
 0x2c0   : > { %v1074_v9 = vperm.slane %v1068_v33, %v2994_v44  ;;  %v1079_v34 = vrot.slane %v1062_v31, 4  ;;  %v1082_v35 = vsel %vm535_vm0, 0.0, %v1081_v32  ;;  %v1085_v43 = vrot.slane %v1078_v40, 4 }
 0x2c1   : > { %v1143_v42 = vsel %vm535_vm0, %v1081_v32, %v1062_v31  ;;  %v1148_v51 = vrot.slane %v1082_v35, 4 }
 0x2c2   : > { %v1080_v49 = vsel %vm535_vm0, 0.0, %v1079_v34  ;;  %v1083_v36 = vrot.slane %v1074_v9, 4  ;;  %v1086_v46 = vsel %vm535_vm0, 0.0, %v1085_v43  ;;  %v1147_v54 = vperm.slane %v1143_v42, %v2981_v28 }
 0x2c3   : > { %v1159_v58 = vrot.slane %v1086_v46, 4  ;;  %v1149_v60 = vsel %vm535_vm0, %v1148_v51, %v1080_v49  ;;  %v1154_v53 = vsel %vm535_vm0, %v1085_v43, %v1074_v9 }
 0x2c4   : > { %v1084_v61 = vsel %vm535_vm0, 0.0, %v1083_v36  ;;  %v1153_v10 = vperm.slane %v1149_v60, %v2981_v28  ;;  %v1158_v29 = vperm.slane %v1154_v53, %v2981_v28  ;;  %v1167_v0 = vrot.slane %v1147_v54, 4 }
 0x2c5   : > { %v1160_v62 = vsel %vm535_vm0, %v1159_v58, %v1084_v61  ;;  %v1444_v36 = vsub.f32 %v3275_v47, %v3319_v48 }
 0x2c6   : > { %v1164_v3 = vperm.slane %v1160_v62, %v2981_v28  ;;  %v1168_v4 = vsel %vm535_vm0, %v1153_v10, %v1167_v0  ;;  %v1179_v5 = vrot.slane %v1158_v29, 4  ;;  %v1165_v6 = vrot.slane %v1153_v10, 4 }
 0x2c7   : > { %v1176_v38 = vperm.slane %v1168_v4, %v2994_v44  ;;  %v1459_v46 = vmul.f32 1.442695, %v1444_v36 }
 0x2c8   : > { %v1421_v7 = vpop.xlane.xlu0 %1420  ;;  %v1180_v23 = vsel %vm535_vm0, %v1164_v3, %v1179_v5  ;;  %v1166_v39 = vsel %vm535_vm0, %v1165_v6, %v1147_v54  ;;  %v1177_v14 = vrot.slane %v1164_v3, 4 }
 0x2c9   : > { %v1439_v15 = vsub.f32 %v3290_v57, %v1421_v7  ;;  %v1188_v55 = vperm.slane %v1180_v23, %v2994_v44  ;;  %v1195_v17 = vrot.slane %v1176_v38, 4  ;;  %v1172_v18 = vperm.slane %v1166_v39, %v2994_v44 }
 0x2ca   : > { %v1178_v21 = vsel %vm535_vm0, %v1177_v14, %v1158_v29  ;;  %v1453_v57 = vmul.f32 1.442695, %v1441_v26 }
 0x2cb   : > { %v1449_v27 = vmul.f32 1.442695, %v1439_v15  ;;  %v1196_v11 = vsel %vm535_vm0, %v1188_v55, %v1195_v17  ;;  %v1184_v63 = vperm.slane %v1178_v21, %v2994_v44  ;;  %v1191_v56 = vrot.slane %v1172_v18, 4 }
 0x2cc   : > { %v1254_v13 = vpack.c.bf16 %v1196_v11, %v1196_v11  ;;  %v1193_v8 = vrot.slane %v1188_v55, 4 }
 0x2cd   : > { %2539 = vpow2.f32 %v1449_v27  ;;  %v1192_v22 = vsel %vm535_vm0, %v1184_v63, %v1191_v56  ;;  %v1189_v59 = vrot.slane %v1184_v63, 4 }
 0x2ce   : > { %v1675_v2 = vsel %vm1616_vm3, %v1254_v13, 0  ;;  %v1252_v24 = vpack.c.bf16 %v1192_v22, %v1192_v22  ;;  %v1194_v41 = vsel %vm535_vm0, %v1193_v8, %v1176_v38  ;;  %2541 = vpow2.f32 %v1453_v57 }
 0x2cf   : > { %1684 = vmatpush.bf16.msrb.mxu0 %v1675_v2  ;;  %v1253_v25 = vpack.c.bf16 %v1194_v41, %v1194_v41  ;;  %v1190_v20 = vsel %vm535_vm0, %v1189_v59, %v1172_v18  ;;  %2543 = vpow2.f32 %v1455_v37  ;;  %v2516_v13 = vunpack.i.h.bf16 %v3328_v16 }
 0x2d0   : > { %v1637_v30 = vsel %vm1616_vm3, %v1252_v24, 0  ;;  %v1251_v31 = vpack.c.bf16 %v1190_v20, %v1190_v20  ;;  %v1433_v40 = vpop.xlane.xlu0 %1432 }
 0x2d1   : > { %1646 = vmatpush.bf16.msrb.mxu2 %v1637_v30  ;;  %v1656_v32 = vsel %vm1616_vm3, %v1253_v25, 0  ;;  %v1443_v34 = vsub.f32 %v3293_v50, %v1433_v40  ;;  %v1101_v59 = vrot.slane %v2516_v13, 4 }
 0x2d2   : > { %1665 = vmatpush.bf16.msra.mxu3 %v1656_v32  ;;  %v1618_v33 = vsel %vm1616_vm3, %v1251_v31, 0 }
 0x2d3   : > { %v3377_v9 = vpop.eup %2539  ;;  %1627 = vmatpush.bf16.msrb.mxu1 %v1618_v33  ;;  %v1457_v42 = vmul.f32 1.442695, %v1443_v34  ;;  %v1089_v33 = vrot.slane %v3295_v52, 4 }
 0x2d4   : > { %v1467_v35 = vsel %vm1412_vm2, %v3377_v9, 0.0  ;;  %v3382_v43 = vpop.eup %2541 }
 0x2d5   : > { %1468 = vadd.xlane.f32.xlu1 %v1467_v35  ;;  %v3384_v51 = vpop.eup %2543  ;;  %v1473_v49 = vsel %vm1412_vm2, %v3382_v43, 0.0  ;;  %2545 = vpow2.f32 %v1457_v42 }
 0x2d6   : > { %v1476_v50 = vsel %vm1412_vm2, %v3384_v51, 0.0  ;;  %2547 = vpow2.f32 %v1459_v46 }
 0x2db   : > { %1474 = vadd.xlane.f32.xlu0 %v1473_v49  ;;  %v3392_v54 = vpop.eup %2545 }
 0x2dc   : > { %v1479_v58 = vsel %vm1412_vm2, %v3392_v54, 0.0  ;;  %v3396_v60 = vpop.eup %2547 }
 0x2dd   : > { %1477 = vadd.xlane.f32.xlu1 %v1476_v50  ;;  %v1482_v53 = vsel %vm1412_vm2, %v3396_v60, 0.0 }
 0x2e5   : > { %1480 = vadd.xlane.f32.xlu1 %v1479_v58 }
 0x2ed   : > { %1483 = vadd.xlane.f32.xlu1 %v1482_v53 }
 0x2fa   : > { %v1472_v47 = vpop.xlane.xlu1 %1471 }
 0x2fb   : > { %2549 = vrcp.f32 %v1472_v47  ;;  %v1541_v0 = vand.u32 2147483648, %v1472_v47  ;;  %v1539_v3 = vand.u32 2147483647, %v1472_v47  ;;  %vm1535_vm5 = vweird.f32 %v1472_v47 }
 0x2fd   : > { %v1542_v6 = vor.u32 1.1754944e-38, %v1541_v0  ;;  %vm1540_vm7 = vcmp.eq.f32.partialorder %v1539_v3, 8.507059e+37 }
 0x301   : > { %v2550_v48 = vpop.eup %2549 }
 0x302   : > { %v1531_v61 = vmul.f32 %v2550_v48, %v1472_v47  ;;  %v1463_v10 = vpop.xlane.xlu2 %1462  ;;  %vm1536_vm4 = vweird.f32 %v2550_v48 }
 0x303   : > { %2551 = vrcp.f32 %v1463_v10  ;;  %vm1537_vm6 = vmor %vm1535_vm5, %vm1536_vm4  ;;  %v1496_v14 = vand.u32 2147483648, %v1463_v10  ;;  %v1494_v55 = vand.u32 2147483647, %v1463_v10  ;;  %vm1490_vm9 = vweird.f32 %v1463_v10 }
 0x304   : > { %v1532_v29 = vsub.f32 1.0, %v1531_v61 }
 0x305   : > { %v1497_v21 = vor.u32 1.1754944e-38, %v1496_v14  ;;  %vm1495_vm11 = vcmp.eq.f32.partialorder %v1494_v55, 8.507059e+37 }
 0x306   : > { %v1533_v62 = vmul.f32 %v2550_v48, %v1532_v29 }
 0x308   : > { %v1534_v4 = vadd.f32 %v2550_v48, %v1533_v62 }
 0x309   : > { %v2552_v5 = vpop.eup %2551 }
 0x30a   : > { %v1538_v38 = vsel %vm1537_vm6, %v2550_v48, %v1534_v4  ;;  %v1486_v26 = vmul.f32 %v2552_v5, %v1463_v10  ;;  %vm1491_vm8 = vweird.f32 %v2552_v5  ;;  %v1028_v57 = vpop.permute.xlu2 %1027 }
 0x30b   : > { %v1543_v7 = vsel %vm1540_vm7, %v1542_v6, %v1538_v38  ;;  %vm1492_vm10 = vmor %vm1490_vm9, %vm1491_vm8  ;;  %v1099_v24 = vrot.slane %v1028_v57, 4  ;;  %v1102_v25 = vsel %vm535_vm0, %v1028_v57, %v1101_v59 }
 0x30c   : > { %v1544_v23 = vmul.f32 %v3303_v19, %v1543_v7  ;;  %v1487_v39 = vsub.f32 1.0, %v1486_v26  ;;  %v1110_v31 = vperm.slane %v1102_v25, %v2981_v28 }
 0x30d   : > { %v1100_v30 = vsel %vm535_vm0, %v1099_v24, %v2516_v13 }
 0x30e   : > { %v1488_v15 = vmul.f32 %v2552_v5, %v1487_v39  ;;  %v1608_v17 = vpack.c.bf16 %v1544_v23, %v1544_v23  ;;  %v1106_v34 = vperm.slane %v1100_v30, %v2981_v28  ;;  %v1123_v50 = vrot.slane %v1110_v31, 4 }
 0x310   : > { %v1489_v18 = vadd.f32 %v2552_v5, %v1488_v15  ;;  %2347 = vmatmul.msk.bf16.vlgmr.msrb.gmra.mxu0 %vm1412_vm2, %v1608_v17  ;;  %v1466_v12 = vpop.xlane.xlu0 %1465  ;;  %v1111_v53 = vrot.slane %v1106_v34, 4 }
 0x311   : > { %2553 = vrcp.f32 %v1466_v12  ;;  %v1511_v2 = vand.u32 2147483648, %v1466_v12  ;;  %v1509_v37 = vand.u32 2147483647, %v1466_v12  ;;  %vm1505_vm13 = vweird.f32 %v1466_v12 }
 0x312   : > { %v1493_v27 = vsel %vm1492_vm10, %v2552_v5, %v1489_v18 }
 0x313   : > { %v1498_v11 = vsel %vm1495_vm11, %v1497_v21, %v1493_v27  ;;  %vm1510_vm15 = vcmp.eq.f32.partialorder %v1509_v37, 8.507059e+37 }
 0x314   : > { %v1499_v63 = vmul.f32 %v3307_v1, %v1498_v11  ;;  %v1512_v1 = vor.u32 1.1754944e-38, %v1511_v2 }
 0x316   : > { %v1605_v19 = vpack.c.bf16 %v1499_v63, %v1499_v63 }
 0x317   : > { %v2554_v56 = vpop.eup %2553 }
 0x318   : > { %v1501_v8 = vmul.f32 %v2554_v56, %v1466_v12  ;;  %2344 = vmatmul.msk.bf16.vlgmr.msrb.gmra.mxu1 %vm1412_vm2, %v1605_v19  ;;  %vm1506_vm12 = vweird.f32 %v2554_v56 }
 0x319   : > { %vm1507_vm14 = vmor %vm1505_vm13, %vm1506_vm12 }
 0x31a   : > { %v1502_v22 = vsub.f32 1.0, %v1501_v8 }
 0x31c   : > { %v1503_v41 = vmul.f32 %v2554_v56, %v1502_v22 }
 0x31e   : > { %v1504_v20 = vadd.f32 %v2554_v56, %v1503_v41 }
 0x320   : > { %v1508_v16 = vsel %vm1507_vm14, %v2554_v56, %v1504_v20 }
 0x321   : > { %v1513_v40 = vsel %vm1510_vm15, %v1512_v1, %v1508_v16 }
 0x322   : > { %v1514_v32 = vmul.f32 %v3311_v45, %v1513_v40 }
 0x323   : > { %v1022_v35 = vpop.permute.xlu0 %1021 }
 0x324   : > { %v1087_v42 = vrot.slane %v1022_v35, 4  ;;  %v1090_v49 = vsel %vm535_vm0, %v1022_v35, %v1089_v33  ;;  %v1606_v36 = vpack.c.bf16 %v1514_v32, %v1514_v32 }
 0x325   : > { %v1098_v46 = vperm.slane %v1090_v49, %v2981_v28 }
 0x326   : > { %v1088_v58 = vsel %vm535_vm0, %v1087_v42, %v3295_v52  ;;  %2345 = vmatmul.msk.bf16.vlgmr.msrb.gmra.mxu2 %vm1412_vm2, %v1606_v36 }
 0x327   : > { %v1094_v45 = vperm.slane %v1088_v58, %v2981_v28  ;;  %v1124_v47 = vsel %vm535_vm0, %v1123_v50, %v1098_v46  ;;  %v1125_v48 = vrot.slane %v1098_v46, 4 }
 0x328   : > { %v1130_v61 = vperm.slane %v1124_v47, %v2994_v44 }
 0x329   : > { %v1112_v10 = vsel %vm535_vm0, %v1111_v53, %v1094_v45  ;;  %v1113_v29 = vrot.slane %v1094_v45, 4  ;;  %v1126_v0 = vsel %vm535_vm0, %v1110_v31, %v1125_v48 }
 0x32a   : > { %v1118_v62 = vperm.slane %v1112_v10, %v2994_v44  ;;  %v1134_v3 = vperm.slane %v1126_v0, %v2994_v44  ;;  %v1139_v5 = vrot.slane %v1130_v61, 4 }
 0x32b   : > { %v1114_v52 = vsel %vm535_vm0, %v1106_v34, %v1113_v29 }
 0x32c   : > { %v1122_v4 = vperm.slane %v1114_v52, %v2994_v44  ;;  %v1141_v6 = vrot.slane %v1134_v3, 4  ;;  %v1135_v38 = vrot.slane %v1118_v62, 4  ;;  %v1140_v55 = vsel %vm535_vm0, 0.0, %v1139_v5 }
 0x32e   : > { %v1137_v26 = vrot.slane %v1122_v4, 4  ;;  %v1142_v7 = vsel %vm535_vm0, 0.0, %v1141_v6  ;;  %v1208_v23 = vsel %vm535_vm0, %v1141_v6, %v1130_v61  ;;  %v1136_v11 = vsel %vm535_vm0, 0.0, %v1135_v38 }
 0x32f   : > { %v1212_v39 = vperm.slane %v1208_v23, %v2981_v28  ;;  %v1213_v14 = vrot.slane %v1142_v7, 4 }
 0x330   : > { %v1138_v15 = vsel %vm535_vm0, 0.0, %v1137_v26  ;;  %v1197_v17 = vsel %vm535_vm0, %v1137_v26, %v1118_v62 }
 0x331   : > { %v1202_v18 = vrot.slane %v1138_v15, 4  ;;  %v1214_v12 = vsel %vm535_vm0, %v1213_v14, %v1140_v55  ;;  %v1233_v21 = vrot.slane %v1212_v39, 4  ;;  %v1201_v27 = vperm.slane %v1197_v17, %v2981_v28 }
 0x332   : > { %v1218_v63 = vperm.slane %v1214_v12, %v2981_v28 }
 0x333   : > { %v1203_v19 = vsel %vm535_vm0, %v1202_v18, %v1136_v11  ;;  %v1221_v56 = vrot.slane %v1201_v27, 4 }
 0x334   : > { %v1231_v13 = vrot.slane %v1218_v63, 4  ;;  %v1207_v8 = vperm.slane %v1203_v19, %v2981_v28  ;;  %v1234_v57 = vsel %vm535_vm0, %v1218_v63, %v1233_v21 }
 0x335   : > { %v1242_v22 = vperm.slane %v1234_v57, %v2994_v44 }
 0x336   : > { %v1222_v59 = vsel %vm535_vm0, %v1207_v8, %v1221_v56  ;;  %v1219_v2 = vrot.slane %v1207_v8, 4  ;;  %v1232_v24 = vsel %vm535_vm0, %v1231_v13, %v1212_v39 }
 0x337   : > { %v1230_v41 = vperm.slane %v1222_v59, %v2994_v44  ;;  %v1247_v37 = vrot.slane %v1242_v22, 4  ;;  %v1238_v25 = vperm.slane %v1232_v24, %v2994_v44 }
 0x338   : > { %v1220_v20 = vsel %vm535_vm0, %v1219_v2, %v1201_v27 }
 0x339   : > { %v1248_v1 = vsel %vm535_vm0, %v1247_v37, %v1230_v41  ;;  %v1226_v30 = vperm.slane %v1220_v20, %v2994_v44  ;;  %v1243_v16 = vrot.slane %v1238_v25, 4  ;;  %v1249_v31 = vrot.slane %v1230_v41, 4 }
 0x33a   : > { %v1257_v40 = vpack.c.bf16 %v1248_v1, %v1248_v1 }
 0x33b   : > { %v1244_v32 = vsel %vm535_vm0, %v1243_v16, %v1226_v30  ;;  %v1250_v33 = vsel %vm535_vm0, %v1242_v22, %v1249_v31  ;;  %v1245_v34 = vrot.slane %v1226_v30, 4 }
 0x33c   : > { %v1732_v35 = vsel %vm1616_vm3, %v1257_v40, 0  ;;  %v1255_v42 = vpack.c.bf16 %v1244_v32, %v1244_v32  ;;  %v1258_v49 = vpack.c.bf16 %v1250_v33, %v1250_v33 }
 0x33d   : > { %1741 = vmatpush.bf16.msrb.mxu3 %v1732_v35  ;;  %v1246_v36 = vsel %vm535_vm0, %v1238_v25, %v1245_v34 }
 0x33e   : > { %v1694_v50 = vsel %vm1616_vm3, %v1255_v42, 0  ;;  %v1751_v46 = vsel %vm1616_vm3, %v1258_v49, 0  ;;  %v1256_v58 = vpack.c.bf16 %v1246_v36, %v1246_v36 }
 0x33f   : > { %1703 = vmatpush.bf16.msra.mxu1 %v1694_v50  ;;  %1760 = vmatpush.bf16.msra.mxu0 %v1751_v46 }
 0x340   : > { %v1713_v53 = vsel %vm1616_vm3, %v1256_v58, 0 }
 0x341   : > { %1722 = vmatpush.bf16.msra.mxu2 %v1713_v53 }
 0x348   : > { %v1469_v45 = vpop.xlane.xlu1 %1468 }
 0x349   : > { %2555 = vrcp.f32 %v1469_v45  ;;  %v1526_v0 = vand.u32 2147483648, %v1469_v45  ;;  %v1524_v3 = vand.u32 2147483647, %v1469_v45  ;;  %vm1520_vm5 = vweird.f32 %v1469_v45 }
 0x34b   : > { %v1527_v38 = vor.u32 1.1754944e-38, %v1526_v0  ;;  %vm1525_vm6 = vcmp.eq.f32.partialorder %v1524_v3, 8.507059e+37 }
 0x34e   : > { %v1475_v47 = vpop.xlane.xlu0 %1474 }
 0x34f   : > { %v2556_v48 = vpop.eup %2555  ;;  %2557 = vrcp.f32 %v1475_v47  ;;  %v1554_v15 = vand.u32 2147483647, %v1475_v47  ;;  %v1556_v55 = vand.u32 2147483648, %v1475_v47  ;;  %vm1550_vm8 = vweird.f32 %v1475_v47 }
 0x350   : > { %v1516_v61 = vmul.f32 %v2556_v48, %v1469_v45  ;;  %v1478_v10 = vpop.xlane.xlu1 %1477  ;;  %vm1521_vm4 = vweird.f32 %v2556_v48 }
 0x351   : > { %2559 = vrcp.f32 %v1478_v10  ;;  %vm1522_vm3 = vmor %vm1520_vm5, %vm1521_vm4  ;;  %v1569_v21 = vand.u32 2147483647, %v1478_v10  ;;  %v1571_v27 = vand.u32 2147483648, %v1478_v10  ;;  %v1557_v56 = vor.u32 1.1754944e-38, %v1556_v55 }
 0x352   : > { %v1517_v29 = vsub.f32 1.0, %v1516_v61  ;;  %vm1555_vm11 = vcmp.eq.f32.partialorder %v1554_v15, 8.507059e+37  ;;  %vm1565_vm12 = vweird.f32 %v1478_v10 }
 0x353   : > { %v1572_v22 = vor.u32 1.1754944e-38, %v1571_v27  ;;  %vm1570_vm14 = vcmp.eq.f32.partialorder %v1569_v21, 8.507059e+37 }
 0x354   : > { %v1518_v62 = vmul.f32 %v2556_v48, %v1517_v29 }
 0x355   : > { %v2558_v52 = vpop.eup %2557 }
 0x356   : > { %v1519_v4 = vadd.f32 %v2556_v48, %v1518_v62  ;;  %v1546_v5 = vmul.f32 %v2558_v52, %v1475_v47  ;;  %vm1551_vm7 = vweird.f32 %v2558_v52 }
 0x357   : > { %v2560_v6 = vpop.eup %2559  ;;  %vm1552_vm10 = vmor %vm1550_vm8, %vm1551_vm7 }
 0x358   : > { %v1523_v26 = vsel %vm1522_vm3, %v2556_v48, %v1519_v4  ;;  %v1547_v7 = vsub.f32 1.0, %v1546_v5  ;;  %v1561_v23 = vmul.f32 %v2560_v6, %v1478_v10  ;;  %v1481_v39 = vpop.xlane.xlu1 %1480  ;;  %vm1566_vm9 = vweird.f32 %v2560_v6 }
 0x359   : > { %v1528_v14 = vsel %vm1525_vm6, %v1527_v38, %v1523_v26  ;;  %2561 = vrcp.f32 %v1481_v39  ;;  %vm1567_vm13 = vmor %vm1565_vm12, %vm1566_vm9  ;;  %v1586_v30 = vand.u32 2147483648, %v1481_v39  ;;  %v1584_v31 = vand.u32 2147483647, %v1481_v39 }
 0x35a   : > { %v1529_v17 = vmul.f32 %v3377_v9, %v1528_v14  ;;  %v1548_v18 = vmul.f32 %v2558_v52, %v1547_v7  ;;  %v1562_v12 = vsub.f32 1.0, %v1561_v23  ;;  %vm1580_vm4 = vweird.f32 %v1481_v39 }
 0x35b   : > { %v1587_v33 = vor.u32 1.1754944e-38, %v1586_v30  ;;  %vm1585_vm3 = vcmp.eq.f32.partialorder %v1584_v31, 8.507059e+37 }
 0x35c   : > { %v1549_v11 = vadd.f32 %v2558_v52, %v1548_v18  ;;  %v1563_v63 = vmul.f32 %v2560_v6, %v1562_v12  ;;  %v1607_v19 = vpack.c.bf16 %v1529_v17, %v1529_v17 }
 0x35e   : > { %v1553_v13 = vsel %vm1552_vm10, %v2558_v52, %v1549_v11  ;;  %v1564_v8 = vadd.f32 %v2560_v6, %v1563_v63  ;;  %2346 = vmatmul.msk.bf16.vlgmr.msra.gmra.mxu3 %vm1412_vm2, %v1607_v19 }
 0x35f   : > { %v2562_v57 = vpop.eup %2561  ;;  %v1558_v9 = vsel %vm1555_vm11, %v1557_v56, %v1553_v13 }
 0x360   : > { %v1559_v59 = vmul.f32 %v3382_v43, %v1558_v9  ;;  %v1568_v2 = vsel %vm1567_vm13, %v2560_v6, %v1564_v8  ;;  %v1576_v24 = vmul.f32 %v2562_v57, %v1481_v39  ;;  %v1484_v41 = vpop.xlane.xlu1 %1483  ;;  %vm1581_vm15 = vweird.f32 %v2562_v57 }
 0x361   : > { %v1573_v37 = vsel %vm1570_vm14, %v1572_v22, %v1568_v2  ;;  %2563 = vrcp.f32 %v1484_v41  ;;  %vm1582_vm5 = vmor %vm1580_vm4, %vm1581_vm15  ;;  %v1601_v36 = vand.u32 2147483648, %v1484_v41  ;;  %v1599_v46 = vand.u32 2147483647, %v1484_v41 }
 0x362   : > { %v1609_v25 = vpack.c.bf16 %v1559_v59, %v1559_v59  ;;  %v1574_v20 = vmul.f32 %v3384_v51, %v1573_v37  ;;  %v1577_v1 = vsub.f32 1.0, %v1576_v24  ;;  %vm1595_vm7 = vweird.f32 %v1484_v41 }
 0x363   : > { %v1602_v45 = vor.u32 1.1754944e-38, %v1601_v36  ;;  %vm1600_vm9 = vcmp.eq.f32.partialorder %v1599_v46, 8.507059e+37 }
 0x364   : > { %v1578_v16 = vmul.f32 %v2562_v57, %v1577_v1  ;;  %2348 = vmatmul.msk.bf16.vlgmr.msra.gmra.mxu1 %vm1412_vm2, %v1609_v25  ;;  %v1610_v40 = vpack.c.bf16 %v1574_v20, %v1574_v20 }
 0x366   : > { %v1579_v32 = vadd.f32 %v2562_v57, %v1578_v16  ;;  %2349 = vmatmul.msk.bf16.vlgmr.msra.gmra.mxu2 %vm1412_vm2, %v1610_v40 }
 0x367   : > { %v2564_v43 = vpop.eup %2563 }
 0x368   : > { %v1583_v34 = vsel %vm1582_vm5, %v2562_v57, %v1579_v32  ;;  %v1591_v35 = vmul.f32 %v2564_v43, %v1484_v41  ;;  %vm1596_vm6 = vweird.f32 %v2564_v43 }
 0x369   : > { %v1588_v42 = vsel %vm1585_vm3, %v1587_v33, %v1583_v34  ;;  %vm1597_vm8 = vmor %vm1595_vm7, %vm1596_vm6 }
 0x36a   : > { %v1589_v51 = vmul.f32 %v3392_v54, %v1588_v42  ;;  %v1592_v49 = vsub.f32 1.0, %v1591_v35 }
 0x36c   : > { %v1593_v50 = vmul.f32 %v2564_v43, %v1592_v49  ;;  %v1611_v58 = vpack.c.bf16 %v1589_v51, %v1589_v51 }
 0x36e   : > { %v1594_v53 = vadd.f32 %v2564_v43, %v1593_v50  ;;  %2350 = vmatmul.msk.bf16.vlgmr.msrb.gmra.mxu3 %vm1412_vm2, %v1611_v58 }
 0x370   : > { %v1598_v47 = vsel %vm1597_vm8, %v2564_v43, %v1594_v53 }
 0x371   : > { %v1603_v48 = vsel %vm1600_vm9, %v1602_v45, %v1598_v47 }
 0x372   : > { %v1604_v61 = vmul.f32 %v3396_v60, %v1603_v48 }
 0x374   : > { %v1612_v10 = vpack.c.bf16 %v1604_v61, %v1604_v61 }
 0x376   : > { %2351 = vmatmul.msk.bf16.vlgmr.msra.gmra.mxu0 %vm1412_vm2, %v1612_v10  ;;  %vm2015_vm2 = vcmask 785408  }
 0x38d   : > { %v1686_v54 = vpop.f32.mrf.mxu0 }
 0x38e   : > { %v1778_v3 = vrot.slane %v1686_v54, 4 }
 0x395   : > { %v1629_v29 = vpop.f32.mrf.mxu1  ;;  %v1688_v0 = vpop.f32.mrf.mxu0 }
 0x396   : > { %v1768_v7 = vrot.slane %v1629_v29, 4 }
 0x39d   : > { %v1631_v62 = vpop.f32.mrf.mxu1 }
 0x3a9   : > { %v1648_v52 = vpop.f32.mrf.mxu2 }
 0x3aa   : > { %v1779_v4 = vsel %vm535_vm0, %v1778_v3, %v1648_v52  ;;  %v1780_v5 = vrot.slane %v1648_v52, 4 }
 0x3ab   : > { %v1785_v60 = vperm.slane %v1779_v4, %v2981_v28 }
 0x3ac   : > { %v1781_v6 = vsel %vm535_vm0, %v1686_v54, %v1780_v5 }
 0x3ad   : > { %v1789_v26 = vperm.slane %v1781_v6, %v2981_v28  ;;  %v1790_v12 = vrot.slane %v1785_v60, 4 }
 0x3af   : > { %v1802_v55 = vrot.slane %v1789_v26, 4 }
 0x3b1   : > { %v1650_v38 = vpop.f32.mrf.mxu2 }
 0x3e1   : > { %v1667_v23 = vpop.f32.mrf.mxu3  ;;  %v1705_v39 = vpop.f32.mrf.mxu1 }
 0x3e2   : > { %v1766_v14 = vrot.slane %v1667_v23, 4  ;;  %v1769_v15 = vsel %vm535_vm0, %v1667_v23, %v1768_v7  ;;  %v1824_v36 = vrot.slane %v1705_v39, 4 }
 0x3e3   : > { %v1777_v17 = vperm.slane %v1769_v15, %v2981_v28 }
 0x3e4   : > { %v1767_v18 = vsel %vm535_vm0, %v1766_v14, %v1629_v29 }
 0x3e5   : > { %v1773_v21 = vperm.slane %v1767_v18, %v2981_v28  ;;  %v1803_v27 = vsel %vm535_vm0, %v1802_v55, %v1777_v17  ;;  %v1804_v11 = vrot.slane %v1777_v17, 4  ;;  %v2422_v55 = vld [vmem:[#allocation8 + $0x38] sm:$0xff] }
 0x3e6   : > { %v1809_v63 = vperm.slane %v1803_v27, %v2994_v44  ;;  %2087 = vmatpush.bf16.msrb.mxu1 %v2422_v55 }
 0x3e7   : > { %v1791_v19 = vsel %vm535_vm0, %v1790_v12, %v1773_v21  ;;  %v1792_v56 = vrot.slane %v1773_v21, 4  ;;  %v1805_v13 = vsel %vm535_vm0, %v1789_v26, %v1804_v11 }
 0x3e8   : > { %v1797_v8 = vperm.slane %v1791_v19, %v2994_v44  ;;  %v1813_v57 = vperm.slane %v1805_v13, %v2994_v44  ;;  %v1818_v24 = vrot.slane %v1809_v63, 4  ;;  %v2421_v19 = vld [vmem:[#allocation8 + $0x30] sm:$0xff] }
 0x3e9   : > { %v1793_v9 = vsel %vm535_vm0, %v1785_v60, %v1792_v56  ;;  %v1669_v22 = vpop.f32.mrf.mxu3  ;;  %v1707_v59 = vpop.f32.mrf.mxu1 }
 0x3ea   : > { %v1801_v2 = vperm.slane %v1793_v9, %v2994_v44  ;;  %v1820_v41 = vrot.slane %v1813_v57, 4  ;;  %v1724_v37 = vpop.f32.mrf.mxu2  ;;  %v1814_v25 = vrot.slane %v1797_v8, 4  ;;  %v1819_v32 = vsel %vm535_vm0, 0.0, %v1818_v24  ;;  %2088 = vmatpush.bf16.msrb.mxu1 %v2421_v19 }
 0x3eb   : > { %v1836_v50 = vrot.slane %v1724_v37, 4 }
 0x3ec   : > { %v1816_v20 = vrot.slane %v1801_v2, 4  ;;  %v1821_v1 = vsel %vm535_vm0, 0.0, %v1820_v41  ;;  %v1889_v30 = vsel %vm535_vm0, %v1820_v41, %v1809_v63  ;;  %v1815_v51 = vsel %vm535_vm0, 0.0, %v1814_v25 }
 0x3ed   : > { %v1893_v16 = vperm.slane %v1889_v30, %v2981_v28  ;;  %v1894_v31 = vrot.slane %v1821_v1, 4 }
 0x3ee   : > { %v1817_v40 = vsel %vm535_vm0, 0.0, %v1816_v20  ;;  %v1878_v43 = vsel %vm535_vm0, %v1816_v20, %v1797_v8 }
 0x3ef   : > { %v1883_v33 = vrot.slane %v1817_v40, 4  ;;  %v1895_v34 = vsel %vm535_vm0, %v1894_v31, %v1819_v32  ;;  %v1914_v35 = vrot.slane %v1893_v16, 4  ;;  %v1882_v42 = vperm.slane %v1878_v43, %v2981_v28 }
 0x3f0   : > { %v1899_v49 = vperm.slane %v1895_v34, %v2981_v28 }
 0x3f1   : > { %v1743_v46 = vpop.f32.mrf.mxu3  ;;  %v1884_v58 = vsel %vm535_vm0, %v1883_v33, %v1815_v51  ;;  %v1902_v53 = vrot.slane %v1882_v42, 4 }
 0x3f2   : > { %v1726_v45 = vpop.f32.mrf.mxu2  ;;  %v1822_v47 = vrot.slane %v1743_v46, 4  ;;  %v1825_v48 = vsel %vm535_vm0, %v1743_v46, %v1824_v36  ;;  %v1888_v61 = vperm.slane %v1884_v58, %v2981_v28  ;;  %v1915_v10 = vsel %vm535_vm0, %v1899_v49, %v1914_v35 }
 0x3f3   : > { %v1833_v54 = vperm.slane %v1825_v48, %v2981_v28  ;;  %v1762_v29 = vpop.f32.mrf.mxu0  ;;  %v1923_v0 = vperm.slane %v1915_v10, %v2994_v44  ;;  %v1912_v62 = vrot.slane %v1899_v49, 4 }
 0x3f4   : > { %v1823_v3 = vsel %vm535_vm0, %v1822_v47, %v1705_v39  ;;  %v1834_v52 = vrot.slane %v1762_v29, 4  ;;  %v1837_v4 = vsel %vm535_vm0, %v1762_v29, %v1836_v50  ;;  %v1903_v5 = vsel %vm535_vm0, %v1888_v61, %v1902_v53 }
 0x3f5   : > { %v1829_v6 = vperm.slane %v1823_v3, %v2981_v28  ;;  %v1860_v38 = vrot.slane %v1833_v54, 4  ;;  %v1845_v26 = vperm.slane %v1837_v4, %v2981_v28  ;;  %v1911_v7 = vperm.slane %v1903_v5, %v2994_v44 }
 0x3f6   : > { %v1835_v60 = vsel %vm535_vm0, %v1834_v52, %v1724_v37  ;;  %v1928_v23 = vrot.slane %v1923_v0, 4  ;;  %v1900_v14 = vrot.slane %v1888_v61, 4  ;;  %v1913_v15 = vsel %vm535_vm0, %v1912_v62, %v1893_v16 }
 0x3f7   : > { %v1848_v39 = vrot.slane %v1829_v6, 4  ;;  %v1841_v17 = vperm.slane %v1835_v60, %v2981_v28  ;;  %v1858_v18 = vrot.slane %v1845_v26, 4  ;;  %v1861_v12 = vsel %vm535_vm0, %v1845_v26, %v1860_v38 }
 0x3f8   : > { %v1869_v21 = vperm.slane %v1861_v12, %v2994_v44  ;;  %v1929_v27 = vsel %vm535_vm0, %v1928_v23, %v1911_v7  ;;  %v1901_v11 = vsel %vm535_vm0, %v1900_v14, %v1882_v42  ;;  %v1919_v63 = vperm.slane %v1913_v15, %v2994_v44  ;;  %v2419_v12 = vld [vmem:[#allocation8 + $0x20] sm:$0xff] }
 0x3f9   : > { %v1846_v56 = vrot.slane %v1841_v17, 4  ;;  %v1849_v13 = vsel %vm535_vm0, %v1841_v17, %v1848_v39  ;;  %v1859_v8 = vsel %vm535_vm0, %v1858_v18, %v1833_v54  ;;  %v1745_v57 = vpop.f32.mrf.mxu3  ;;  %v1907_v9 = vperm.slane %v1901_v11, %v2994_v44  ;;  %v2416_v11 = vld [vmem:[#allocation8 + $0x8] sm:$0xff] }
 0x3fa   : > { %v1857_v22 = vperm.slane %v1849_v13, %v2994_v44  ;;  %v1865_v59 = vperm.slane %v1859_v8, %v2994_v44  ;;  %v1876_v2 = vrot.slane %v1869_v21, 4  ;;  %v1924_v37 = vrot.slane %v1919_v63, 4  ;;  %v2418_v21 = vld [vmem:[#allocation8 + $0x18] sm:$0xff] }
 0x3fb   : > { %v1847_v24 = vsel %vm535_vm0, %v1846_v56, %v1829_v6  ;;  %v1764_v41 = vpop.f32.mrf.mxu0  ;;  %v1926_v25 = vrot.slane %v1907_v9, 4  ;;  %v1930_v20 = vrot.slane %v1911_v7, 4 }
 0x3fc   : > { %v1853_v1 = vperm.slane %v1847_v24, %v2994_v44  ;;  %v1872_v30 = vrot.slane %v1857_v22, 4  ;;  %v1874_v16 = vrot.slane %v1865_v59, 4  ;;  %v1877_v31 = vsel %vm535_vm0, 0.0, %v1876_v2 }
 0x3fd   : > { %v1943_v40 = vsel %vm535_vm0, %v1876_v2, %v1865_v59  ;;  %v1948_v32 = vrot.slane %v1877_v31, 4  ;;  %v1927_v43 = vsel %vm535_vm0, %v1919_v63, %v1926_v25  ;;  %v1931_v33 = vsel %vm535_vm0, %v1923_v0, %v1930_v20  ;;  %v2415_v63 = vld [vmem:[#allocation8] sm:$0xff] }
 0x3fe   : > { %v1870_v34 = vrot.slane %v1853_v1, 4  ;;  %v1873_v35 = vsel %vm535_vm0, 0.0, %v1872_v30  ;;  %v1875_v42 = vsel %vm535_vm0, 0.0, %v1874_v16  ;;  %v1932_v51 = vsel %vm535_vm0, %v1872_v30, %v1853_v1  ;;  %v2532_v16 = vld [vmem:[%s3589_s4] ss:$0 sm:$0xff] }
 0x3ff   : > { %v1937_v49 = vrot.slane %v1873_v35, 4  ;;  %v1947_v36 = vperm.slane %v1943_v40, %v2981_v28  ;;  %v1949_v50 = vsel %vm535_vm0, %v1948_v32, %v1875_v42  ;;  %v1936_v46 = vperm.slane %v1932_v51, %v2981_v28 }
 0x400   : > { %v1953_v58 = vperm.slane %v1949_v50, %v2981_v28  ;;  %v1871_v53 = vsel %vm535_vm0, 0.0, %v1870_v34  ;;  %v1925_v45 = vsel %vm535_vm0, %v1924_v37, %v1907_v9 }
 0x401   : > { %v1968_v47 = vrot.slane %v1947_v36, 4  ;;  %v1938_v48 = vsel %vm535_vm0, %v1937_v49, %v1871_v53  ;;  %v1956_v61 = vrot.slane %v1936_v46, 4 }
 0x402   : > { %v1942_v10 = vperm.slane %v1938_v48, %v2981_v28  ;;  %v1966_v54 = vrot.slane %v1953_v58, 4 }
 0x403   : > { %v1969_v29 = vsel %vm535_vm0, %v1953_v58, %v1968_v47 }
 0x404   : > { %v1957_v0 = vsel %vm535_vm0, %v1942_v10, %v1956_v61  ;;  %v1977_v62 = vperm.slane %v1969_v29, %v2994_v44  ;;  %v1954_v3 = vrot.slane %v1942_v10, 4  ;;  %v1967_v52 = vsel %vm535_vm0, %v1966_v54, %v1947_v36 }
 0x405   : > { %v1965_v4 = vperm.slane %v1957_v0, %v2994_v44  ;;  %v1973_v5 = vperm.slane %v1967_v52, %v2994_v44 }
 0x406   : > { %v1982_v6 = vrot.slane %v1977_v62, 4  ;;  %v1955_v38 = vsel %vm535_vm0, %v1954_v3, %v1936_v46 }
 0x407   : > { %v1961_v26 = vperm.slane %v1955_v38, %v2994_v44  ;;  %v1978_v28 = vrot.slane %v1973_v5, 4  ;;  %v1984_v39 = vrot.slane %v1965_v4, 4  ;;  %v2420_v44 = vld [vmem:[#allocation8 + $0x28] sm:$0xff] }
 0x408   : > { %v1983_v7 = vsel %vm535_vm0, %v1982_v6, %v1965_v4  ;;  %2089 = vmatpush.bf16.msrb.mxu1 %v2420_v44 }
 0x409   : > { %v2522_v60 = vpack.i.bf16 %v1983_v7, %v1929_v27  ;;  %v1980_v23 = vrot.slane %v1961_v26, 4  ;;  %v1979_v14 = vsel %vm535_vm0, %v1978_v28, %v1961_v26  ;;  %v1985_v17 = vsel %vm535_vm0, %v1977_v62, %v1984_v39  ;;  %v2417_v27 = vld [vmem:[#allocation8 + $0x10] sm:$0xff] }
 0x40a   : > { %v2527_v18 = vpack.i.bf16 %v1985_v17, %v1931_v33 }
 0x40b   : > { %2523 = vrot.lane.b32.xlu1 %v2522_v60, %s2768_s24  ;;  %v1981_v15 = vsel %vm535_vm0, %v1973_v5, %v1980_v23  ;;  %vm2012_vm0 = vcmask 523264   ;;  %s2701_s24 = scalar_lea.hbm %s2700_s11, 16 }
 0x40c   : > { %v2517_v55 = vpack.i.bf16 %v1981_v15, %v1927_v43  ;;  %2090 = vmatpush.bf16.msrb.mxu1 %v2419_v12  ;;  %p2702_p1 = scmp.ne.s32.totalorder %s2700_s11, %s2701_s24 }
 0x40e   : > { %2518 = vrot.lane.b32.xlu2 %v2517_v55, %s2769_s29  ;;  %p2703_p4 = pnand %p2702_p1, %p2890_p3 }
 0x410   : > { %2091 = vmatpush.bf16.msrb.mxu1 %v2418_v21  ;;  %p2704_p8 = pneg %p2703_p4 }
 0x414   : > { %2092 = vmatpush.bf16.msrb.mxu1 %v2417_v27 }
 0x416   : > { %2528 = vrot.lane.b32.xlu2 %v2527_v18, %s2770_s28  ;;  %s2705_s28 = scalar_lea.hbm %s3590_s5, 32 }
 0x417   : > { %p2707_p9 = scmp.lt.s32.totalorder %s2705_s28, %s2701_s24 }
 0x418   : > { %2093 = vmatpush.bf16.msrb.mxu1 %v2416_v11 }
 0x419   : > { %p2708_p2 = por %p2707_p9, %p2706_p11 }
 0x41b   : > { %p2709_p10 = pnand %p2708_p2, %p2704_p8 }
 0x41c   : > { %2094 = vmatpush.bf16.msrb.mxu1 %v2415_v63 }
 0x468   : > { %v2519_v19 = vpop.permute.xlu2 %2518 }
 0x469   : > { %v2521_v56 = vunpack.i.h.bf16 %v2519_v19  ;;  %v2520_v13 = vunpack.i.l.bf16 %v2519_v19 }
 0x46b   : > { %v2010_v59 = vsel %vm1259_vm1, %v1925_v45, %v2520_v13  ;;  %v2011_v2 = vsel %vm1259_vm1, %v1979_v14, %v2521_v56 }
 0x470   : > { %v2529_v8 = vpop.permute.xlu2 %2528 }
 0x471   : > { %v2531_v24 = vunpack.i.h.bf16 %v2529_v8  ;;  %v2530_v41 = vunpack.i.l.bf16 %v2529_v8 }
 0x47d   : > { %v2524_v57 = vpop.permute.xlu1 %2523 }
 0x47e   : > { %v2526_v9 = vunpack.i.h.bf16 %v2524_v57  ;;  %v2525_v22 = vunpack.i.l.bf16 %v2524_v57 }
 0x480   : > { %v2013_v37 = vsel %vm2012_vm0, %v2010_v59, %v2525_v22  ;;  %v2014_v25 = vsel %vm2012_vm0, %v2011_v2, %v2526_v9 }
 0x481   : > { %v2016_v20 = vsel %vm2015_vm2, %v2013_v37, %v2530_v41  ;;  %v2017_v1 = vsel %vm2015_vm2, %v2014_v25, %v2531_v24 }
 0x482   : > { %v2018_v30 = vpack.c.bf16 %v2017_v1, %v2016_v20 }
 0x484   : > { %2095 = vmatmul.bf16.vlgmr.msrb.gmra.mxu1 %v2018_v30 }
 0x501   : > { %v2096_v31 = vpop.f32.mrf.mxu1 }
 0x502   : > { %v2097_v40 = vadd.f32 %v2532_v16, %v2096_v31 }
 0x504   : > { %2101 = vst [vmem:[%s292_s13] sm:$0xff] %v2097_v40 }
 0x509   : > { %v2098_v32 = vpop.f32.mrf.mxu1 }
 0x50a   : > { %v2099_v43 = vadd.f32 %v2532_v16, %v2098_v32 }
 0x50c   : > { %2102 = vst [vmem:[%s292_s13 + $0x8] sm:$0xff] %v2099_v43 }
 0x50d   : > { %2712 = shalt.err (!%p2709_p10)
}
 0x50e   : > { %s2773_s17 = smov 128   ;;  %s2774_s26 = smov 8  }
 0x50f   : > { %2438 = dma.vmem_to_hbm [thread:$0]  (%p2890_p3), %s2117_s7, 256, %s2119_s8, %s2104_s27, %s2773_s17, %s2773_s17, %s2774_s26  }
 0x510 PF: > { %s2133_s6 = sand.u32 1, %s2747_s18   ;;  %p3599_p12 = scmp.ge.s32.totalorder %s2759_s21, 2 }
 0x511   : > { %s2134_s13 = scalar_lea.sflag [#allocation4], %s2133_s6 }
 0x512   : > { %p2455_p13 = pnand %p3599_p12, %p2840_p6 }
 0x514   : > { %p2456_p0 = pneg %p2455_p13 }
 0x516   : > { %2742 = dma.done.wait (%p2456_p0), %s2134_s13, 256  }
 0x517   : > { %2744 = vsyncadd (%p2456_p0), %s2134_s13, 4294967040  ;;  %p20_p5 = scmp.ge.s32.totalorder %s2877_s30, 4   ;;  %s3600_s18 = smov %s2751_s19 }
 0x518   : > { %s3601_s19 = smov %s2755_s20  ;;  %s3602_s20 = smov %s2886_s9 }
 0x519   : > { %s3603_s21 = smov %s2877_s30  ;;  %22 = sbr.rel (!%p20_p5) target bundleno = 7 (0x7), region = 97 }
 0x51e   :  { %2140 = vsyncpa [#allocation3], 1 }
 0x51f   :  { %2142 = vsyncpa [#allocation3 + $0x1], 1 }
 0x520   :  { %2143 = vsyncpa [#allocation6], 1 }
 0x521   :  { %2144 = vsyncpa [#allocation9], 1 }
 0x522   :  { %2145 = vsyncpa [#allocation4], 1 }
 0x523   :  { %2147 = vsyncpa [#allocation4 + $0x1], 1 }

</bundles_post_ra>
